<compile_context>
chip_gen: v5e
topology: v5e:2x2
jax: 0.10.0
libtpu: 0.0.40
codegen_flags: <defaults>
</compile_context>

<pallas_src>
import functools

import jax
import jax.numpy as jnp
from jax.experimental import pallas as pl
from jax.experimental.pallas import tpu as pltpu

_LANE = 128
_SUBLANE = 8


def _round_up(n, m):
    return ((n + m - 1) // m) * m


def _pad_axis(a, axis, target):
    pad = target - a.shape[axis]
    if pad <= 0:
        return a
    widths = [(0, 0)] * a.ndim
    widths[axis] = (0, pad)
    return jnp.pad(a, widths)


# ----------------------------------------------------------------------------
# Kernel: whole flow in one invocation; block loop unrolled inside.
# ----------------------------------------------------------------------------
def _maf_realnvp_kernel(n_blocks, n_hidden, Hp,
                        x_ref, mask_ref, w0_ref, b0_ref,
                        s_wh_ref, s_bh_ref, s_wl_ref, s_bl_ref,
                        t_wh_ref, t_bh_ref, t_wl_ref, t_bl_ref,
                        u_ref, logdet_ref):
    u = x_ref[...]                                   # (Bp, Dp)
    logdet = jnp.zeros_like(u)

    for b in range(n_blocks):
        mask = mask_ref[b]                           # (1, Dp)
        inv_mask = 1.0 - mask                        # hoisted, used twice
        mx = u * mask

        # Fused first layers of scale & translation nets: (Bp,Dp)@(Dp,2Hp)
        h = jnp.dot(mx, w0_ref[b], preferred_element_type=jnp.float32) + b0_ref[b]
        h_s = h[:, :Hp]                              # lane-aligned split
        h_t = h[:, Hp:]

        # scale net: Linear -> [Tanh -> Linear]*n_hidden -> Tanh -> Linear
        for k in range(n_hidden):
            h_s = jnp.tanh(h_s)
            h_s = jnp.dot(h_s, s_wh_ref[b, k],
                          preferred_element_type=jnp.float32) + s_bh_ref[b, k]
        h_s = jnp.tanh(h_s)
        s = jnp.dot(h_s, s_wl_ref[b],
                    preferred_element_type=jnp.float32) + s_bl_ref[b]

        # translation net: Linear -> [ReLU -> Linear]*n_hidden -> ReLU -> Linear
        for k in range(n_hidden):
            h_t = jnp.maximum(h_t, 0.0)
            h_t = jnp.dot(h_t, t_wh_ref[b, k],
                          preferred_element_type=jnp.float32) + t_bh_ref[b, k]
        h_t = jnp.maximum(h_t, 0.0)
        t = jnp.dot(h_t, t_wl_ref[b],
                    preferred_element_type=jnp.float32) + t_bl_ref[b]

        # RealNVP coupling (LinearMaskedCoupling.forward)
        u = mx + inv_mask * (u - t) * jnp.exp(-s)
        logdet = logdet + (-inv_mask * s)

    u_ref[...] = u
    logdet_ref[...] = logdet


# ----------------------------------------------------------------------------
# Wrapper: pad to lane-dense shapes, fuse the twin first layers, call once.
# ----------------------------------------------------------------------------
@functools.partial(jax.jit, static_argnums=(2,))
def maf_realnvp_forward(x, params, n_hidden):
    """Returns (u, sum_log_abs_det_jacobians), both (B, D)."""
    B, D = x.shape
    n_blocks, _, H = params["s_b0"].shape
    Dp = _round_up(D, _LANE)
    Hp = _round_up(H, _LANE)
    Bp = _round_up(B, _SUBLANE)

    x_p = _pad_axis(_pad_axis(x, 1, Dp), 0, Bp)                    # (Bp, Dp)
    mask_p = _pad_axis(params["mask"], 2, Dp)                      # (nb, 1, Dp)

    # Fused first-layer weights/biases: (nb, Dp, 2Hp) / (nb, 1, 2Hp).
    s_w0 = _pad_axis(_pad_axis(params["s_w0"], 1, Dp), 2, Hp)
    t_w0 = _pad_axis(_pad_axis(params["t_w0"], 1, Dp), 2, Hp)
    w0 = jnp.concatenate([s_w0, t_w0], axis=-1)
    b0 = jnp.concatenate([_pad_axis(params["s_b0"], 2, Hp),
                          _pad_axis(params["t_b0"], 2, Hp)], axis=-1)

    def hid(w, bvec):
        w = _pad_axis(_pad_axis(w, 2, Hp), 3, Hp)                  # (nb, nh, Hp, Hp)
        bvec = _pad_axis(bvec[:, :, None, :], 3, Hp)               # (nb, nh, 1, Hp)
        return w, bvec

    s_wh, s_bh = hid(params["s_wh"], params["s_bh"])
    t_wh, t_bh = hid(params["t_wh"], params["t_bh"])

    s_wl = _pad_axis(_pad_axis(params["s_wl"], 1, Hp), 2, Dp)
    t_wl = _pad_axis(_pad_axis(params["t_wl"], 1, Hp), 2, Dp)
    s_bl = _pad_axis(params["s_bl"], 2, Dp)
    t_bl = _pad_axis(params["t_bl"], 2, Dp)

    kernel = functools.partial(_maf_realnvp_kernel, n_blocks, n_hidden, Hp)
    vmem_spec = lambda: pl.BlockSpec(memory_space=pltpu.MemorySpace.VMEM)

    u_p, logdet_p = pl.pallas_call(
        kernel,
        out_shape=(jax.ShapeDtypeStruct((Bp, Dp), jnp.float32),
                   jax.ShapeDtypeStruct((Bp, Dp), jnp.float32)),
        in_specs=[vmem_spec() for _ in range(12)],
        out_specs=(vmem_spec(), vmem_spec()),
        input_output_aliases={0: 0},   # padded x buffer reused for u
    )(x_p, mask_p, w0, b0, s_wh, s_bh, s_wl, s_bl, t_wh, t_bh, t_wl, t_bl)

    return u_p[:B, :D], logdet_p[:B, :D]


# ----------------------------------------------------------------------------
# Deterministic parameter construction (mirrors MAFRealNVP.__init__ shapes)
# ----------------------------------------------------------------------------
def make_params(key, n_blocks, input_size, hidden_size, n_hidden):
    D, H = input_size, hidden_size
    keys = jax.random.split(key, 12)
    scale = 0.1

    # alternating masks: arange(D) % 2, flipped each block
    mask0 = (jnp.arange(D) % 2).astype(jnp.float32)
    masks = jnp.stack([mask0 if (i % 2 == 0) else 1.0 - mask0
                       for i in range(n_blocks)])                  # (n_blocks, D)

    def w(k, shape):
        return scale * jax.random.normal(k, shape, dtype=jnp.float32)

    params = {
        "mask": masks.reshape(n_blocks, 1, D),
        # scale net
        "s_w0": w(keys[0], (n_blocks, D, H)),
        "s_b0": w(keys[1], (n_blocks, 1, H)),
        "s_wh": w(keys[2], (n_blocks, n_hidden, H, H)),
        "s_bh": w(keys[3], (n_blocks, n_hidden, H)),
        "s_wl": w(keys[4], (n_blocks, H, D)),
        "s_bl": w(keys[5], (n_blocks, 1, D)),
        # translation net
        "t_w0": w(keys[6], (n_blocks, D, H)),
        "t_b0": w(keys[7], (n_blocks, 1, H)),
        "t_wh": w(keys[8], (n_blocks, n_hidden, H, H)),
        "t_bh": w(keys[9], (n_blocks, n_hidden, H)),
        "t_wl": w(keys[10], (n_blocks, H, D)),
        "t_bl": w(keys[11], (n_blocks, 1, D)),
    }
    return params


# Pure-JAX reference (mirrors FlowSequential.forward over LinearMaskedCoupling)
def ref_forward(x, params, n_hidden):
    u = x
    logdet = jnp.zeros_like(x)
    n_blocks = params["mask"].shape[0]
    for i in range(n_blocks):
        mask = params["mask"][i, 0]
        mx = u * mask
        h = mx @ params["s_w0"][i] + params["s_b0"][i, 0]
        for k in range(n_hidden):
            h = jnp.tanh(h)
            h = h @ params["s_wh"][i, k] + params["s_bh"][i, k]
        h = jnp.tanh(h)
        s = h @ params["s_wl"][i] + params["s_bl"][i, 0]

        g = mx @ params["t_w0"][i] + params["t_b0"][i, 0]
        for k in range(n_hidden):
            g = jnp.maximum(g, 0.0)
            g = g @ params["t_wh"][i, k] + params["t_bh"][i, k]
        g = jnp.maximum(g, 0.0)
        t = g @ params["t_wl"][i] + params["t_bl"][i, 0]

        new_u = mx + (1.0 - mask) * (u - t) * jnp.exp(-s)
        logdet = logdet + (-(1.0 - mask) * s)
        u = new_u
    return u, logdet


if __name__ == "__main__":
    # Small shapes consistent with MAFRealNVP(n_blocks, input_size, hidden_size, n_hidden)
    n_blocks, input_size, hidden_size, n_hidden = 4, 6, 32, 1
    batch = 8

    key = jax.random.PRNGKey(0)
    kx, kp = jax.random.split(key)
    x = jax.random.normal(kx, (batch, input_size), dtype=jnp.float32)
    params = make_params(kp, n_blocks, input_size, hidden_size, n_hidden)

    u, logdet = maf_realnvp_forward(x, params, n_hidden)
    u, logdet = jax.block_until_ready((u, logdet))

    u_ref, logdet_ref = ref_forward(x, params, n_hidden)
    assert jnp.allclose(u, u_ref, atol=1e-5, rtol=1e-5), "u mismatch"
    assert jnp.allclose(logdet, logdet_ref, atol=1e-5, rtol=1e-5), "logdet mismatch"

    print("KERNEL_OK")
</pallas_src>

<mosaic_0001>
module attributes {stable_mosaic.version = 11 : i64} {
  func.func @_maf_realnvp_kernel(%arg0: memref<8x128xf32, #tpu.memory_space<vmem>>, %arg1: memref<4x1x128xf32, #tpu.memory_space<vmem>>, %arg2: memref<4x128x256xf32, #tpu.memory_space<vmem>>, %arg3: memref<4x1x256xf32, #tpu.memory_space<vmem>>, %arg4: memref<4x1x128x128xf32, #tpu.memory_space<vmem>>, %arg5: memref<4x1x1x128xf32, #tpu.memory_space<vmem>>, %arg6: memref<4x128x128xf32, #tpu.memory_space<vmem>>, %arg7: memref<4x1x128xf32, #tpu.memory_space<vmem>>, %arg8: memref<4x1x128x128xf32, #tpu.memory_space<vmem>>, %arg9: memref<4x1x1x128xf32, #tpu.memory_space<vmem>>, %arg10: memref<4x128x128xf32, #tpu.memory_space<vmem>>, %arg11: memref<4x1x128xf32, #tpu.memory_space<vmem>>, %arg12: memref<8x128xf32, #tpu.memory_space<vmem>>, %arg13: memref<8x128xf32, #tpu.memory_space<vmem>>) attributes {dimension_semantics = [], scalar_prefetch = 0 : i64, scratch_operands = 0 : i64, tpu.core_type = #tpu.core_type<tc>} {
    %c0 = arith.constant 0 : index
    %c0_0 = arith.constant 0 : index
    %0 = vector.load %arg0[%c0, %c0_0] : memref<8x128xf32, #tpu.memory_space<vmem>>, vector<8x128xf32>
    %cst = arith.constant 0.000000e+00 : f32
    %1 = vector.broadcast %cst : f32 to vector<8x128xf32>
    %c0_1 = arith.constant 0 : index
    %c0_2 = arith.constant 0 : index
    %c0_3 = arith.constant 0 : index
    %2 = vector.load %arg1[%c0_1, %c0_2, %c0_3] : memref<4x1x128xf32, #tpu.memory_space<vmem>>, vector<1x1x128xf32>
    %3 = vector.shape_cast %2 : vector<1x1x128xf32> to vector<1x128xf32>
    %cst_4 = arith.constant 1.000000e+00 : f32
    %4 = vector.broadcast %cst_4 : f32 to vector<1x128xf32>
    %5 = arith.subf %4, %3 : vector<1x128xf32>
    %6 = vector.broadcast %3 : vector<1x128xf32> to vector<8x128xf32>
    %7 = arith.mulf %0, %6 : vector<8x128xf32>
    %c0_5 = arith.constant 0 : index
    %c0_6 = arith.constant 0 : index
    %c0_7 = arith.constant 0 : index
    %8 = vector.load %arg2[%c0_5, %c0_6, %c0_7] : memref<4x128x256xf32, #tpu.memory_space<vmem>>, vector<1x128x256xf32>
    %9 = vector.shape_cast %8 : vector<1x128x256xf32> to vector<128x256xf32>
    %cst_8 = arith.constant dense<0.000000e+00> : vector<8x256xf32>
    %10 = tpu.matmul %7, %9, %cst_8 {dimension_numbers = #tpu.dot_dimension_numbers<[1], [0], [0], [1], [0, 0, 1, 1], [], []>} : vector<8x128xf32>, vector<128x256xf32>, vector<8x256xf32> -> vector<8x256xf32>
    %c0_9 = arith.constant 0 : index
    %c0_10 = arith.constant 0 : index
    %c0_11 = arith.constant 0 : index
    %11 = vector.load %arg3[%c0_9, %c0_10, %c0_11] : memref<4x1x256xf32, #tpu.memory_space<vmem>>, vector<1x1x256xf32>
    %12 = vector.shape_cast %11 : vector<1x1x256xf32> to vector<1x256xf32>
    %13 = vector.broadcast %12 : vector<1x256xf32> to vector<8x256xf32>
    %14 = arith.addf %10, %13 : vector<8x256xf32>
    %15 = vector.extract_strided_slice %14 {offsets = [0, 0], sizes = [8, 128], strides = [1, 1]} : vector<8x256xf32> to vector<8x128xf32>
    %16 = vector.extract_strided_slice %14 {offsets = [0, 128], sizes = [8, 128], strides = [1, 1]} : vector<8x256xf32> to vector<8x128xf32>
    %17 = math.tanh %15 : vector<8x128xf32>
    %c0_12 = arith.constant 0 : index
    %c0_13 = arith.constant 0 : index
    %c0_14 = arith.constant 0 : index
    %c0_15 = arith.constant 0 : index
    %18 = vector.load %arg4[%c0_12, %c0_13, %c0_14, %c0_15] : memref<4x1x128x128xf32, #tpu.memory_space<vmem>>, vector<1x1x128x128xf32>
    %19 = vector.shape_cast %18 : vector<1x1x128x128xf32> to vector<128x128xf32>
    %cst_16 = arith.constant dense<0.000000e+00> : vector<8x128xf32>
    %20 = tpu.matmul %17, %19, %cst_16 {dimension_numbers = #tpu.dot_dimension_numbers<[1], [0], [0], [1], [0, 0, 1, 1], [], []>} : vector<8x128xf32>, vector<128x128xf32>, vector<8x128xf32> -> vector<8x128xf32>
    %c0_17 = arith.constant 0 : index
    %c0_18 = arith.constant 0 : index
    %c0_19 = arith.constant 0 : index
    %c0_20 = arith.constant 0 : index
    %21 = vector.load %arg5[%c0_17, %c0_18, %c0_19, %c0_20] : memref<4x1x1x128xf32, #tpu.memory_space<vmem>>, vector<1x1x1x128xf32>
    %22 = vector.shape_cast %21 : vector<1x1x1x128xf32> to vector<1x128xf32>
    %23 = vector.broadcast %22 : vector<1x128xf32> to vector<8x128xf32>
    %24 = arith.addf %20, %23 : vector<8x128xf32>
    %25 = math.tanh %24 : vector<8x128xf32>
    %c0_21 = arith.constant 0 : index
    %c0_22 = arith.constant 0 : index
    %c0_23 = arith.constant 0 : index
    %26 = vector.load %arg6[%c0_21, %c0_22, %c0_23] : memref<4x128x128xf32, #tpu.memory_space<vmem>>, vector<1x128x128xf32>
    %27 = vector.shape_cast %26 : vector<1x128x128xf32> to vector<128x128xf32>
    %cst_24 = arith.constant dense<0.000000e+00> : vector<8x128xf32>
    %28 = tpu.matmul %25, %27, %cst_24 {dimension_numbers = #tpu.dot_dimension_numbers<[1], [0], [0], [1], [0, 0, 1, 1], [], []>} : vector<8x128xf32>, vector<128x128xf32>, vector<8x128xf32> -> vector<8x128xf32>
    %c0_25 = arith.constant 0 : index
    %c0_26 = arith.constant 0 : index
    %c0_27 = arith.constant 0 : index
    %29 = vector.load %arg7[%c0_25, %c0_26, %c0_27] : memref<4x1x128xf32, #tpu.memory_space<vmem>>, vector<1x1x128xf32>
    %30 = vector.shape_cast %29 : vector<1x1x128xf32> to vector<1x128xf32>
    %31 = vector.broadcast %30 : vector<1x128xf32> to vector<8x128xf32>
    %32 = arith.addf %28, %31 : vector<8x128xf32>
    %cst_28 = arith.constant 0.000000e+00 : f32
    %33 = vector.broadcast %cst_28 : f32 to vector<8x128xf32>
    %34 = arith.maximumf %16, %33 : vector<8x128xf32>
    %c0_29 = arith.constant 0 : index
    %c0_30 = arith.constant 0 : index
    %c0_31 = arith.constant 0 : index
    %c0_32 = arith.constant 0 : index
    %35 = vector.load %arg8[%c0_29, %c0_30, %c0_31, %c0_32] : memref<4x1x128x128xf32, #tpu.memory_space<vmem>>, vector<1x1x128x128xf32>
    %36 = vector.shape_cast %35 : vector<1x1x128x128xf32> to vector<128x128xf32>
    %cst_33 = arith.constant dense<0.000000e+00> : vector<8x128xf32>
    %37 = tpu.matmul %34, %36, %cst_33 {dimension_numbers = #tpu.dot_dimension_numbers<[1], [0], [0], [1], [0, 0, 1, 1], [], []>} : vector<8x128xf32>, vector<128x128xf32>, vector<8x128xf32> -> vector<8x128xf32>
    %c0_34 = arith.constant 0 : index
    %c0_35 = arith.constant 0 : index
    %c0_36 = arith.constant 0 : index
    %c0_37 = arith.constant 0 : index
    %38 = vector.load %arg9[%c0_34, %c0_35, %c0_36, %c0_37] : memref<4x1x1x128xf32, #tpu.memory_space<vmem>>, vector<1x1x1x128xf32>
    %39 = vector.shape_cast %38 : vector<1x1x1x128xf32> to vector<1x128xf32>
    %40 = vector.broadcast %39 : vector<1x128xf32> to vector<8x128xf32>
    %41 = arith.addf %37, %40 : vector<8x128xf32>
    %cst_38 = arith.constant 0.000000e+00 : f32
    %42 = vector.broadcast %cst_38 : f32 to vector<8x128xf32>
    %43 = arith.maximumf %41, %42 : vector<8x128xf32>
    %c0_39 = arith.constant 0 : index
    %c0_40 = arith.constant 0 : index
    %c0_41 = arith.constant 0 : index
    %44 = vector.load %arg10[%c0_39, %c0_40, %c0_41] : memref<4x128x128xf32, #tpu.memory_space<vmem>>, vector<1x128x128xf32>
    %45 = vector.shape_cast %44 : vector<1x128x128xf32> to vector<128x128xf32>
    %cst_42 = arith.constant dense<0.000000e+00> : vector<8x128xf32>
    %46 = tpu.matmul %43, %45, %cst_42 {dimension_numbers = #tpu.dot_dimension_numbers<[1], [0], [0], [1], [0, 0, 1, 1], [], []>} : vector<8x128xf32>, vector<128x128xf32>, vector<8x128xf32> -> vector<8x128xf32>
    %c0_43 = arith.constant 0 : index
    %c0_44 = arith.constant 0 : index
    %c0_45 = arith.constant 0 : index
    %47 = vector.load %arg11[%c0_43, %c0_44, %c0_45] : memref<4x1x128xf32, #tpu.memory_space<vmem>>, vector<1x1x128xf32>
    %48 = vector.shape_cast %47 : vector<1x1x128xf32> to vector<1x128xf32>
    %49 = vector.broadcast %48 : vector<1x128xf32> to vector<8x128xf32>
    %50 = arith.addf %46, %49 : vector<8x128xf32>
    %51 = arith.subf %0, %50 : vector<8x128xf32>
    %52 = vector.broadcast %5 : vector<1x128xf32> to vector<8x128xf32>
    %53 = arith.mulf %52, %51 : vector<8x128xf32>
    %cst_46 = arith.constant 0.000000e+00 : f32
    %54 = vector.broadcast %cst_46 : f32 to vector<8x128xf32>
    %55 = arith.subf %54, %32 : vector<8x128xf32>
    %56 = math.exp %55 : vector<8x128xf32>
    %57 = arith.mulf %53, %56 : vector<8x128xf32>
    %58 = arith.addf %7, %57 : vector<8x128xf32>
    %cst_47 = arith.constant 0.000000e+00 : f32
    %59 = vector.broadcast %cst_47 : f32 to vector<1x128xf32>
    %60 = arith.subf %59, %5 : vector<1x128xf32>
    %61 = vector.broadcast %60 : vector<1x128xf32> to vector<8x128xf32>
    %62 = arith.mulf %61, %32 : vector<8x128xf32>
    %63 = arith.addf %1, %62 : vector<8x128xf32>
    %c1 = arith.constant 1 : index
    %c0_48 = arith.constant 0 : index
    %c0_49 = arith.constant 0 : index
    %64 = vector.load %arg1[%c1, %c0_48, %c0_49] : memref<4x1x128xf32, #tpu.memory_space<vmem>>, vector<1x1x128xf32>
    %65 = vector.shape_cast %64 : vector<1x1x128xf32> to vector<1x128xf32>
    %cst_50 = arith.constant 1.000000e+00 : f32
    %66 = vector.broadcast %cst_50 : f32 to vector<1x128xf32>
    %67 = arith.subf %66, %65 : vector<1x128xf32>
    %68 = vector.broadcast %65 : vector<1x128xf32> to vector<8x128xf32>
    %69 = arith.mulf %58, %68 : vector<8x128xf32>
    %c1_51 = arith.constant 1 : index
    %c0_52 = arith.constant 0 : index
    %c0_53 = arith.constant 0 : index
    %70 = vector.load %arg2[%c1_51, %c0_52, %c0_53] : memref<4x128x256xf32, #tpu.memory_space<vmem>>, vector<1x128x256xf32>
    %71 = vector.shape_cast %70 : vector<1x128x256xf32> to vector<128x256xf32>
    %cst_54 = arith.constant dense<0.000000e+00> : vector<8x256xf32>
    %72 = tpu.matmul %69, %71, %cst_54 {dimension_numbers = #tpu.dot_dimension_numbers<[1], [0], [0], [1], [0, 0, 1, 1], [], []>} : vector<8x128xf32>, vector<128x256xf32>, vector<8x256xf32> -> vector<8x256xf32>
    %c1_55 = arith.constant 1 : index
    %c0_56 = arith.constant 0 : index
    %c0_57 = arith.constant 0 : index
    %73 = vector.load %arg3[%c1_55, %c0_56, %c0_57] : memref<4x1x256xf32, #tpu.memory_space<vmem>>, vector<1x1x256xf32>
    %74 = vector.shape_cast %73 : vector<1x1x256xf32> to vector<1x256xf32>
    %75 = vector.broadcast %74 : vector<1x256xf32> to vector<8x256xf32>
    %76 = arith.addf %72, %75 : vector<8x256xf32>
    %77 = vector.extract_strided_slice %76 {offsets = [0, 0], sizes = [8, 128], strides = [1, 1]} : vector<8x256xf32> to vector<8x128xf32>
    %78 = vector.extract_strided_slice %76 {offsets = [0, 128], sizes = [8, 128], strides = [1, 1]} : vector<8x256xf32> to vector<8x128xf32>
    %79 = math.tanh %77 : vector<8x128xf32>
    %c1_58 = arith.constant 1 : index
    %c0_59 = arith.constant 0 : index
    %c0_60 = arith.constant 0 : index
    %c0_61 = arith.constant 0 : index
    %80 = vector.load %arg4[%c1_58, %c0_59, %c0_60, %c0_61] : memref<4x1x128x128xf32, #tpu.memory_space<vmem>>, vector<1x1x128x128xf32>
    %81 = vector.shape_cast %80 : vector<1x1x128x128xf32> to vector<128x128xf32>
    %cst_62 = arith.constant dense<0.000000e+00> : vector<8x128xf32>
    %82 = tpu.matmul %79, %81, %cst_62 {dimension_numbers = #tpu.dot_dimension_numbers<[1], [0], [0], [1], [0, 0, 1, 1], [], []>} : vector<8x128xf32>, vector<128x128xf32>, vector<8x128xf32> -> vector<8x128xf32>
    %c1_63 = arith.constant 1 : index
    %c0_64 = arith.constant 0 : index
    %c0_65 = arith.constant 0 : index
    %c0_66 = arith.constant 0 : index
    %83 = vector.load %arg5[%c1_63, %c0_64, %c0_65, %c0_66] : memref<4x1x1x128xf32, #tpu.memory_space<vmem>>, vector<1x1x1x128xf32>
    %84 = vector.shape_cast %83 : vector<1x1x1x128xf32> to vector<1x128xf32>
    %85 = vector.broadcast %84 : vector<1x128xf32> to vector<8x128xf32>
    %86 = arith.addf %82, %85 : vector<8x128xf32>
    %87 = math.tanh %86 : vector<8x128xf32>
    %c1_67 = arith.constant 1 : index
    %c0_68 = arith.constant 0 : index
    %c0_69 = arith.constant 0 : index
    %88 = vector.load %arg6[%c1_67, %c0_68, %c0_69] : memref<4x128x128xf32, #tpu.memory_space<vmem>>, vector<1x128x128xf32>
    %89 = vector.shape_cast %88 : vector<1x128x128xf32> to vector<128x128xf32>
    %cst_70 = arith.constant dense<0.000000e+00> : vector<8x128xf32>
    %90 = tpu.matmul %87, %89, %cst_70 {dimension_numbers = #tpu.dot_dimension_numbers<[1], [0], [0], [1], [0, 0, 1, 1], [], []>} : vector<8x128xf32>, vector<128x128xf32>, vector<8x128xf32> -> vector<8x128xf32>
    %c1_71 = arith.constant 1 : index
    %c0_72 = arith.constant 0 : index
    %c0_73 = arith.constant 0 : index
    %91 = vector.load %arg7[%c1_71, %c0_72, %c0_73] : memref<4x1x128xf32, #tpu.memory_space<vmem>>, vector<1x1x128xf32>
    %92 = vector.shape_cast %91 : vector<1x1x128xf32> to vector<1x128xf32>
    %93 = vector.broadcast %92 : vector<1x128xf32> to vector<8x128xf32>
    %94 = arith.addf %90, %93 : vector<8x128xf32>
    %cst_74 = arith.constant 0.000000e+00 : f32
    %95 = vector.broadcast %cst_74 : f32 to vector<8x128xf32>
    %96 = arith.maximumf %78, %95 : vector<8x128xf32>
    %c1_75 = arith.constant 1 : index
    %c0_76 = arith.constant 0 : index
    %c0_77 = arith.constant 0 : index
    %c0_78 = arith.constant 0 : index
    %97 = vector.load %arg8[%c1_75, %c0_76, %c0_77, %c0_78] : memref<4x1x128x128xf32, #tpu.memory_space<vmem>>, vector<1x1x128x128xf32>
    %98 = vector.shape_cast %97 : vector<1x1x128x128xf32> to vector<128x128xf32>
    %cst_79 = arith.constant dense<0.000000e+00> : vector<8x128xf32>
    %99 = tpu.matmul %96, %98, %cst_79 {dimension_numbers = #tpu.dot_dimension_numbers<[1], [0], [0], [1], [0, 0, 1, 1], [], []>} : vector<8x128xf32>, vector<128x128xf32>, vector<8x128xf32> -> vector<8x128xf32>
    %c1_80 = arith.constant 1 : index
    %c0_81 = arith.constant 0 : index
    %c0_82 = arith.constant 0 : index
    %c0_83 = arith.constant 0 : index
    %100 = vector.load %arg9[%c1_80, %c0_81, %c0_82, %c0_83] : memref<4x1x1x128xf32, #tpu.memory_space<vmem>>, vector<1x1x1x128xf32>
    %101 = vector.shape_cast %100 : vector<1x1x1x128xf32> to vector<1x128xf32>
    %102 = vector.broadcast %101 : vector<1x128xf32> to vector<8x128xf32>
    %103 = arith.addf %99, %102 : vector<8x128xf32>
    %cst_84 = arith.constant 0.000000e+00 : f32
    %104 = vector.broadcast %cst_84 : f32 to vector<8x128xf32>
    %105 = arith.maximumf %103, %104 : vector<8x128xf32>
    %c1_85 = arith.constant 1 : index
    %c0_86 = arith.constant 0 : index
    %c0_87 = arith.constant 0 : index
    %106 = vector.load %arg10[%c1_85, %c0_86, %c0_87] : memref<4x128x128xf32, #tpu.memory_space<vmem>>, vector<1x128x128xf32>
    %107 = vector.shape_cast %106 : vector<1x128x128xf32> to vector<128x128xf32>
    %cst_88 = arith.constant dense<0.000000e+00> : vector<8x128xf32>
    %108 = tpu.matmul %105, %107, %cst_88 {dimension_numbers = #tpu.dot_dimension_numbers<[1], [0], [0], [1], [0, 0, 1, 1], [], []>} : vector<8x128xf32>, vector<128x128xf32>, vector<8x128xf32> -> vector<8x128xf32>
    %c1_89 = arith.constant 1 : index
    %c0_90 = arith.constant 0 : index
    %c0_91 = arith.constant 0 : index
    %109 = vector.load %arg11[%c1_89, %c0_90, %c0_91] : memref<4x1x128xf32, #tpu.memory_space<vmem>>, vector<1x1x128xf32>
    %110 = vector.shape_cast %109 : vector<1x1x128xf32> to vector<1x128xf32>
    %111 = vector.broadcast %110 : vector<1x128xf32> to vector<8x128xf32>
    %112 = arith.addf %108, %111 : vector<8x128xf32>
    %113 = arith.subf %58, %112 : vector<8x128xf32>
    %114 = vector.broadcast %67 : vector<1x128xf32> to vector<8x128xf32>
    %115 = arith.mulf %114, %113 : vector<8x128xf32>
    %cst_92 = arith.constant 0.000000e+00 : f32
    %116 = vector.broadcast %cst_92 : f32 to vector<8x128xf32>
    %117 = arith.subf %116, %94 : vector<8x128xf32>
    %118 = math.exp %117 : vector<8x128xf32>
    %119 = arith.mulf %115, %118 : vector<8x128xf32>
    %120 = arith.addf %69, %119 : vector<8x128xf32>
    %cst_93 = arith.constant 0.000000e+00 : f32
    %121 = vector.broadcast %cst_93 : f32 to vector<1x128xf32>
    %122 = arith.subf %121, %67 : vector<1x128xf32>
    %123 = vector.broadcast %122 : vector<1x128xf32> to vector<8x128xf32>
    %124 = arith.mulf %123, %94 : vector<8x128xf32>
    %125 = arith.addf %63, %124 : vector<8x128xf32>
    %c2 = arith.constant 2 : index
    %c0_94 = arith.constant 0 : index
    %c0_95 = arith.constant 0 : index
    %126 = vector.load %arg1[%c2, %c0_94, %c0_95] : memref<4x1x128xf32, #tpu.memory_space<vmem>>, vector<1x1x128xf32>
    %127 = vector.shape_cast %126 : vector<1x1x128xf32> to vector<1x128xf32>
    %cst_96 = arith.constant 1.000000e+00 : f32
    %128 = vector.broadcast %cst_96 : f32 to vector<1x128xf32>
    %129 = arith.subf %128, %127 : vector<1x128xf32>
    %130 = vector.broadcast %127 : vector<1x128xf32> to vector<8x128xf32>
    %131 = arith.mulf %120, %130 : vector<8x128xf32>
    %c2_97 = arith.constant 2 : index
    %c0_98 = arith.constant 0 : index
    %c0_99 = arith.constant 0 : index
    %132 = vector.load %arg2[%c2_97, %c0_98, %c0_99] : memref<4x128x256xf32, #tpu.memory_space<vmem>>, vector<1x128x256xf32>
    %133 = vector.shape_cast %132 : vector<1x128x256xf32> to vector<128x256xf32>
    %cst_100 = arith.constant dense<0.000000e+00> : vector<8x256xf32>
    %134 = tpu.matmul %131, %133, %cst_100 {dimension_numbers = #tpu.dot_dimension_numbers<[1], [0], [0], [1], [0, 0, 1, 1], [], []>} : vector<8x128xf32>, vector<128x256xf32>, vector<8x256xf32> -> vector<8x256xf32>
    %c2_101 = arith.constant 2 : index
    %c0_102 = arith.constant 0 : index
    %c0_103 = arith.constant 0 : index
    %135 = vector.load %arg3[%c2_101, %c0_102, %c0_103] : memref<4x1x256xf32, #tpu.memory_space<vmem>>, vector<1x1x256xf32>
    %136 = vector.shape_cast %135 : vector<1x1x256xf32> to vector<1x256xf32>
    %137 = vector.broadcast %136 : vector<1x256xf32> to vector<8x256xf32>
    %138 = arith.addf %134, %137 : vector<8x256xf32>
    %139 = vector.extract_strided_slice %138 {offsets = [0, 0], sizes = [8, 128], strides = [1, 1]} : vector<8x256xf32> to vector<8x128xf32>
    %140 = vector.extract_strided_slice %138 {offsets = [0, 128], sizes = [8, 128], strides = [1, 1]} : vector<8x256xf32> to vector<8x128xf32>
    %141 = math.tanh %139 : vector<8x128xf32>
    %c2_104 = arith.constant 2 : index
    %c0_105 = arith.constant 0 : index
    %c0_106 = arith.constant 0 : index
    %c0_107 = arith.constant 0 : index
    %142 = vector.load %arg4[%c2_104, %c0_105, %c0_106, %c0_107] : memref<4x1x128x128xf32, #tpu.memory_space<vmem>>, vector<1x1x128x128xf32>
    %143 = vector.shape_cast %142 : vector<1x1x128x128xf32> to vector<128x128xf32>
    %cst_108 = arith.constant dense<0.000000e+00> : vector<8x128xf32>
    %144 = tpu.matmul %141, %143, %cst_108 {dimension_numbers = #tpu.dot_dimension_numbers<[1], [0], [0], [1], [0, 0, 1, 1], [], []>} : vector<8x128xf32>, vector<128x128xf32>, vector<8x128xf32> -> vector<8x128xf32>
    %c2_109 = arith.constant 2 : index
    %c0_110 = arith.constant 0 : index
    %c0_111 = arith.constant 0 : index
    %c0_112 = arith.constant 0 : index
    %145 = vector.load %arg5[%c2_109, %c0_110, %c0_111, %c0_112] : memref<4x1x1x128xf32, #tpu.memory_space<vmem>>, vector<1x1x1x128xf32>
    %146 = vector.shape_cast %145 : vector<1x1x1x128xf32> to vector<1x128xf32>
    %147 = vector.broadcast %146 : vector<1x128xf32> to vector<8x128xf32>
    %148 = arith.addf %144, %147 : vector<8x128xf32>
    %149 = math.tanh %148 : vector<8x128xf32>
    %c2_113 = arith.constant 2 : index
    %c0_114 = arith.constant 0 : index
    %c0_115 = arith.constant 0 : index
    %150 = vector.load %arg6[%c2_113, %c0_114, %c0_115] : memref<4x128x128xf32, #tpu.memory_space<vmem>>, vector<1x128x128xf32>
    %151 = vector.shape_cast %150 : vector<1x128x128xf32> to vector<128x128xf32>
    %cst_116 = arith.constant dense<0.000000e+00> : vector<8x128xf32>
    %152 = tpu.matmul %149, %151, %cst_116 {dimension_numbers = #tpu.dot_dimension_numbers<[1], [0], [0], [1], [0, 0, 1, 1], [], []>} : vector<8x128xf32>, vector<128x128xf32>, vector<8x128xf32> -> vector<8x128xf32>
    %c2_117 = arith.constant 2 : index
    %c0_118 = arith.constant 0 : index
    %c0_119 = arith.constant 0 : index
    %153 = vector.load %arg7[%c2_117, %c0_118, %c0_119] : memref<4x1x128xf32, #tpu.memory_space<vmem>>, vector<1x1x128xf32>
    %154 = vector.shape_cast %153 : vector<1x1x128xf32> to vector<1x128xf32>
    %155 = vector.broadcast %154 : vector<1x128xf32> to vector<8x128xf32>
    %156 = arith.addf %152, %155 : vector<8x128xf32>
    %cst_120 = arith.constant 0.000000e+00 : f32
    %157 = vector.broadcast %cst_120 : f32 to vector<8x128xf32>
    %158 = arith.maximumf %140, %157 : vector<8x128xf32>
    %c2_121 = arith.constant 2 : index
    %c0_122 = arith.constant 0 : index
    %c0_123 = arith.constant 0 : index
    %c0_124 = arith.constant 0 : index
    %159 = vector.load %arg8[%c2_121, %c0_122, %c0_123, %c0_124] : memref<4x1x128x128xf32, #tpu.memory_space<vmem>>, vector<1x1x128x128xf32>
    %160 = vector.shape_cast %159 : vector<1x1x128x128xf32> to vector<128x128xf32>
    %cst_125 = arith.constant dense<0.000000e+00> : vector<8x128xf32>
    %161 = tpu.matmul %158, %160, %cst_125 {dimension_numbers = #tpu.dot_dimension_numbers<[1], [0], [0], [1], [0, 0, 1, 1], [], []>} : vector<8x128xf32>, vector<128x128xf32>, vector<8x128xf32> -> vector<8x128xf32>
    %c2_126 = arith.constant 2 : index
    %c0_127 = arith.constant 0 : index
    %c0_128 = arith.constant 0 : index
    %c0_129 = arith.constant 0 : index
    %162 = vector.load %arg9[%c2_126, %c0_127, %c0_128, %c0_129] : memref<4x1x1x128xf32, #tpu.memory_space<vmem>>, vector<1x1x1x128xf32>
    %163 = vector.shape_cast %162 : vector<1x1x1x128xf32> to vector<1x128xf32>
    %164 = vector.broadcast %163 : vector<1x128xf32> to vector<8x128xf32>
    %165 = arith.addf %161, %164 : vector<8x128xf32>
    %cst_130 = arith.constant 0.000000e+00 : f32
    %166 = vector.broadcast %cst_130 : f32 to vector<8x128xf32>
    %167 = arith.maximumf %165, %166 : vector<8x128xf32>
    %c2_131 = arith.constant 2 : index
    %c0_132 = arith.constant 0 : index
    %c0_133 = arith.constant 0 : index
    %168 = vector.load %arg10[%c2_131, %c0_132, %c0_133] : memref<4x128x128xf32, #tpu.memory_space<vmem>>, vector<1x128x128xf32>
    %169 = vector.shape_cast %168 : vector<1x128x128xf32> to vector<128x128xf32>
    %cst_134 = arith.constant dense<0.000000e+00> : vector<8x128xf32>
    %170 = tpu.matmul %167, %169, %cst_134 {dimension_numbers = #tpu.dot_dimension_numbers<[1], [0], [0], [1], [0, 0, 1, 1], [], []>} : vector<8x128xf32>, vector<128x128xf32>, vector<8x128xf32> -> vector<8x128xf32>
    %c2_135 = arith.constant 2 : index
    %c0_136 = arith.constant 0 : index
    %c0_137 = arith.constant 0 : index
    %171 = vector.load %arg11[%c2_135, %c0_136, %c0_137] : memref<4x1x128xf32, #tpu.memory_space<vmem>>, vector<1x1x128xf32>
    %172 = vector.shape_cast %171 : vector<1x1x128xf32> to vector<1x128xf32>
    %173 = vector.broadcast %172 : vector<1x128xf32> to vector<8x128xf32>
    %174 = arith.addf %170, %173 : vector<8x128xf32>
    %175 = arith.subf %120, %174 : vector<8x128xf32>
    %176 = vector.broadcast %129 : vector<1x128xf32> to vector<8x128xf32>
    %177 = arith.mulf %176, %175 : vector<8x128xf32>
    %cst_138 = arith.constant 0.000000e+00 : f32
    %178 = vector.broadcast %cst_138 : f32 to vector<8x128xf32>
    %179 = arith.subf %178, %156 : vector<8x128xf32>
    %180 = math.exp %179 : vector<8x128xf32>
    %181 = arith.mulf %177, %180 : vector<8x128xf32>
    %182 = arith.addf %131, %181 : vector<8x128xf32>
    %cst_139 = arith.constant 0.000000e+00 : f32
    %183 = vector.broadcast %cst_139 : f32 to vector<1x128xf32>
    %184 = arith.subf %183, %129 : vector<1x128xf32>
    %185 = vector.broadcast %184 : vector<1x128xf32> to vector<8x128xf32>
    %186 = arith.mulf %185, %156 : vector<8x128xf32>
    %187 = arith.addf %125, %186 : vector<8x128xf32>
    %c3 = arith.constant 3 : index
    %c0_140 = arith.constant 0 : index
    %c0_141 = arith.constant 0 : index
    %188 = vector.load %arg1[%c3, %c0_140, %c0_141] : memref<4x1x128xf32, #tpu.memory_space<vmem>>, vector<1x1x128xf32>
    %189 = vector.shape_cast %188 : vector<1x1x128xf32> to vector<1x128xf32>
    %cst_142 = arith.constant 1.000000e+00 : f32
    %190 = vector.broadcast %cst_142 : f32 to vector<1x128xf32>
    %191 = arith.subf %190, %189 : vector<1x128xf32>
    %192 = vector.broadcast %189 : vector<1x128xf32> to vector<8x128xf32>
    %193 = arith.mulf %182, %192 : vector<8x128xf32>
    %c3_143 = arith.constant 3 : index
    %c0_144 = arith.constant 0 : index
    %c0_145 = arith.constant 0 : index
    %194 = vector.load %arg2[%c3_143, %c0_144, %c0_145] : memref<4x128x256xf32, #tpu.memory_space<vmem>>, vector<1x128x256xf32>
    %195 = vector.shape_cast %194 : vector<1x128x256xf32> to vector<128x256xf32>
    %cst_146 = arith.constant dense<0.000000e+00> : vector<8x256xf32>
    %196 = tpu.matmul %193, %195, %cst_146 {dimension_numbers = #tpu.dot_dimension_numbers<[1], [0], [0], [1], [0, 0, 1, 1], [], []>} : vector<8x128xf32>, vector<128x256xf32>, vector<8x256xf32> -> vector<8x256xf32>
    %c3_147 = arith.constant 3 : index
    %c0_148 = arith.constant 0 : index
    %c0_149 = arith.constant 0 : index
    %197 = vector.load %arg3[%c3_147, %c0_148, %c0_149] : memref<4x1x256xf32, #tpu.memory_space<vmem>>, vector<1x1x256xf32>
    %198 = vector.shape_cast %197 : vector<1x1x256xf32> to vector<1x256xf32>
    %199 = vector.broadcast %198 : vector<1x256xf32> to vector<8x256xf32>
    %200 = arith.addf %196, %199 : vector<8x256xf32>
    %201 = vector.extract_strided_slice %200 {offsets = [0, 0], sizes = [8, 128], strides = [1, 1]} : vector<8x256xf32> to vector<8x128xf32>
    %202 = vector.extract_strided_slice %200 {offsets = [0, 128], sizes = [8, 128], strides = [1, 1]} : vector<8x256xf32> to vector<8x128xf32>
    %203 = math.tanh %201 : vector<8x128xf32>
    %c3_150 = arith.constant 3 : index
    %c0_151 = arith.constant 0 : index
    %c0_152 = arith.constant 0 : index
    %c0_153 = arith.constant 0 : index
    %204 = vector.load %arg4[%c3_150, %c0_151, %c0_152, %c0_153] : memref<4x1x128x128xf32, #tpu.memory_space<vmem>>, vector<1x1x128x128xf32>
    %205 = vector.shape_cast %204 : vector<1x1x128x128xf32> to vector<128x128xf32>
    %cst_154 = arith.constant dense<0.000000e+00> : vector<8x128xf32>
    %206 = tpu.matmul %203, %205, %cst_154 {dimension_numbers = #tpu.dot_dimension_numbers<[1], [0], [0], [1], [0, 0, 1, 1], [], []>} : vector<8x128xf32>, vector<128x128xf32>, vector<8x128xf32> -> vector<8x128xf32>
    %c3_155 = arith.constant 3 : index
    %c0_156 = arith.constant 0 : index
    %c0_157 = arith.constant 0 : index
    %c0_158 = arith.constant 0 : index
    %207 = vector.load %arg5[%c3_155, %c0_156, %c0_157, %c0_158] : memref<4x1x1x128xf32, #tpu.memory_space<vmem>>, vector<1x1x1x128xf32>
    %208 = vector.shape_cast %207 : vector<1x1x1x128xf32> to vector<1x128xf32>
    %209 = vector.broadcast %208 : vector<1x128xf32> to vector<8x128xf32>
    %210 = arith.addf %206, %209 : vector<8x128xf32>
    %211 = math.tanh %210 : vector<8x128xf32>
    %c3_159 = arith.constant 3 : index
    %c0_160 = arith.constant 0 : index
    %c0_161 = arith.constant 0 : index
    %212 = vector.load %arg6[%c3_159, %c0_160, %c0_161] : memref<4x128x128xf32, #tpu.memory_space<vmem>>, vector<1x128x128xf32>
    %213 = vector.shape_cast %212 : vector<1x128x128xf32> to vector<128x128xf32>
    %cst_162 = arith.constant dense<0.000000e+00> : vector<8x128xf32>
    %214 = tpu.matmul %211, %213, %cst_162 {dimension_numbers = #tpu.dot_dimension_numbers<[1], [0], [0], [1], [0, 0, 1, 1], [], []>} : vector<8x128xf32>, vector<128x128xf32>, vector<8x128xf32> -> vector<8x128xf32>
    %c3_163 = arith.constant 3 : index
    %c0_164 = arith.constant 0 : index
    %c0_165 = arith.constant 0 : index
    %215 = vector.load %arg7[%c3_163, %c0_164, %c0_165] : memref<4x1x128xf32, #tpu.memory_space<vmem>>, vector<1x1x128xf32>
    %216 = vector.shape_cast %215 : vector<1x1x128xf32> to vector<1x128xf32>
    %217 = vector.broadcast %216 : vector<1x128xf32> to vector<8x128xf32>
    %218 = arith.addf %214, %217 : vector<8x128xf32>
    %cst_166 = arith.constant 0.000000e+00 : f32
    %219 = vector.broadcast %cst_166 : f32 to vector<8x128xf32>
    %220 = arith.maximumf %202, %219 : vector<8x128xf32>
    %c3_167 = arith.constant 3 : index
    %c0_168 = arith.constant 0 : index
    %c0_169 = arith.constant 0 : index
    %c0_170 = arith.constant 0 : index
    %221 = vector.load %arg8[%c3_167, %c0_168, %c0_169, %c0_170] : memref<4x1x128x128xf32, #tpu.memory_space<vmem>>, vector<1x1x128x128xf32>
    %222 = vector.shape_cast %221 : vector<1x1x128x128xf32> to vector<128x128xf32>
    %cst_171 = arith.constant dense<0.000000e+00> : vector<8x128xf32>
    %223 = tpu.matmul %220, %222, %cst_171 {dimension_numbers = #tpu.dot_dimension_numbers<[1], [0], [0], [1], [0, 0, 1, 1], [], []>} : vector<8x128xf32>, vector<128x128xf32>, vector<8x128xf32> -> vector<8x128xf32>
    %c3_172 = arith.constant 3 : index
    %c0_173 = arith.constant 0 : index
    %c0_174 = arith.constant 0 : index
    %c0_175 = arith.constant 0 : index
    %224 = vector.load %arg9[%c3_172, %c0_173, %c0_174, %c0_175] : memref<4x1x1x128xf32, #tpu.memory_space<vmem>>, vector<1x1x1x128xf32>
    %225 = vector.shape_cast %224 : vector<1x1x1x128xf32> to vector<1x128xf32>
    %226 = vector.broadcast %225 : vector<1x128xf32> to vector<8x128xf32>
    %227 = arith.addf %223, %226 : vector<8x128xf32>
    %cst_176 = arith.constant 0.000000e+00 : f32
    %228 = vector.broadcast %cst_176 : f32 to vector<8x128xf32>
    %229 = arith.maximumf %227, %228 : vector<8x128xf32>
    %c3_177 = arith.constant 3 : index
    %c0_178 = arith.constant 0 : index
    %c0_179 = arith.constant 0 : index
    %230 = vector.load %arg10[%c3_177, %c0_178, %c0_179] : memref<4x128x128xf32, #tpu.memory_space<vmem>>, vector<1x128x128xf32>
    %231 = vector.shape_cast %230 : vector<1x128x128xf32> to vector<128x128xf32>
    %cst_180 = arith.constant dense<0.000000e+00> : vector<8x128xf32>
    %232 = tpu.matmul %229, %231, %cst_180 {dimension_numbers = #tpu.dot_dimension_numbers<[1], [0], [0], [1], [0, 0, 1, 1], [], []>} : vector<8x128xf32>, vector<128x128xf32>, vector<8x128xf32> -> vector<8x128xf32>
    %c3_181 = arith.constant 3 : index
    %c0_182 = arith.constant 0 : index
    %c0_183 = arith.constant 0 : index
    %233 = vector.load %arg11[%c3_181, %c0_182, %c0_183] : memref<4x1x128xf32, #tpu.memory_space<vmem>>, vector<1x1x128xf32>
    %234 = vector.shape_cast %233 : vector<1x1x128xf32> to vector<1x128xf32>
    %235 = vector.broadcast %234 : vector<1x128xf32> to vector<8x128xf32>
    %236 = arith.addf %232, %235 : vector<8x128xf32>
    %237 = arith.subf %182, %236 : vector<8x128xf32>
    %238 = vector.broadcast %191 : vector<1x128xf32> to vector<8x128xf32>
    %239 = arith.mulf %238, %237 : vector<8x128xf32>
    %cst_184 = arith.constant 0.000000e+00 : f32
    %240 = vector.broadcast %cst_184 : f32 to vector<8x128xf32>
    %241 = arith.subf %240, %218 : vector<8x128xf32>
    %242 = math.exp %241 : vector<8x128xf32>
    %243 = arith.mulf %239, %242 : vector<8x128xf32>
    %244 = arith.addf %193, %243 : vector<8x128xf32>
    %cst_185 = arith.constant 0.000000e+00 : f32
    %245 = vector.broadcast %cst_185 : f32 to vector<1x128xf32>
    %246 = arith.subf %245, %191 : vector<1x128xf32>
    %247 = vector.broadcast %246 : vector<1x128xf32> to vector<8x128xf32>
    %248 = arith.mulf %247, %218 : vector<8x128xf32>
    %249 = arith.addf %187, %248 : vector<8x128xf32>
    %c0_186 = arith.constant 0 : index
    %c0_187 = arith.constant 0 : index
    %250 = vector.load %arg12[%c0_186, %c0_187] : memref<8x128xf32, #tpu.memory_space<vmem>>, vector<8x128xf32>
    tpu.vector_store %arg12[%c0_186, %c0_187], %244 {strides = array<i32>} : memref<8x128xf32, #tpu.memory_space<vmem>>, vector<8x128xf32>,
    %c0_188 = arith.constant 0 : index
    %c0_189 = arith.constant 0 : index
    %251 = vector.load %arg13[%c0_188, %c0_189] : memref<8x128xf32, #tpu.memory_space<vmem>>, vector<8x128xf32>
    tpu.vector_store %arg13[%c0_188, %c0_189], %249 {strides = array<i32>} : memref<8x128xf32, #tpu.memory_space<vmem>>, vector<8x128xf32>,
    return
  }
}

</mosaic_0001>

<bundles_post_ra>
// kernel: maf_realnvp_forward.1
= control target key start
LH: loop header
LB: loop body
LE: loop exit
PB: predicated region body
PF: predicated region fallthrough
CT: control target
= control target key end

     0   :  { %s2894_s0 = inlined_call_operand.vmem [shape: f32[8,128], index: 0, kind: input, shape index: {}, may-alias: {0,12}]   ;;  %s2895_s1 = inlined_call_operand.vmem [shape: f32[4,1,128], index: 1, kind: input, shape index: {}]   ;;  %s2896_s2 = inlined_call_operand.vmem [shape: f32[4,128,256], index: 2, kind: input, shape index: {}]   ;;  %s2897_s3 = inlined_call_operand.vmem [shape: f32[4,1,256], index: 3, kind: input, shape index: {}]   ;;  %s2898_s4 = inlined_call_operand.vmem [shape: f32[4,1,128,128], index: 4, kind: input, shape index: {}]   ;;  %s2899_s5 = inlined_call_operand.vmem [shape: f32[4,1,1,128], index: 5, kind: input, shape index: {}]   ;;  %s2900_s6 = inlined_call_operand.vmem [shape: f32[4,128,128], index: 6, kind: input, shape index: {}]   ;;  %s2901_s7 = inlined_call_operand.vmem [shape: f32[4,1,128], index: 7, kind: input, shape index: {}]   ;;  %s2902_s8 = inlined_call_operand.vmem [shape: f32[4,1,128,128], index: 8, kind: input, shape index: {}]   ;;  %s2903_s9 = inlined_call_operand.vmem [shape: f32[4,1,1,128], index: 9, kind: input, shape index: {}]   ;;  %s2904_s10 = inlined_call_operand.vmem [shape: f32[4,128,128], index: 10, kind: input, shape index: {}]   ;;  %s2905_s11 = inlined_call_operand.vmem [shape: f32[4,1,128], index: 11, kind: input, shape index: {}]   ;;  %s2906_s12 = inlined_call_operand.vmem [shape: f32[8,128], index: 12, kind: output, shape index: {0}, may-alias: {0,12}]   ;;  %s2907_s13 = inlined_call_operand.hbm [shape: f32[8,128], index: 13, kind: output, shape index: {1}]  }
   0x1   :  { %v81_v0 = vld [vmem:[%s2896_s2 + $0xf0] sm:$0xff]  ;;  %v79_v1 = vld [vmem:[%s2896_s2 + $0xe0] sm:$0xff]  ;;  %v82_v4 = vld [vmem:[%s2896_s2 + $0xf8] sm:$0xff] }
   0x2   :  { %89 = vmatpush.msra.mxu0 %v81_v0  ;;  %v77_v2 = vld [vmem:[%s2896_s2 + $0xd0] sm:$0xff]  ;;  %v75_v3 = vld [vmem:[%s2896_s2 + $0xc0] sm:$0xff]  ;;  %109 = vmatpush.msra.mxu1 %v82_v4  ;;  %v80_v6 = vld [vmem:[%s2896_s2 + $0xe8] sm:$0xff] }
   0x3   :  { %v73_v5 = vld [vmem:[%s2896_s2 + $0xb0] sm:$0xff]  ;;  %v78_v7 = vld [vmem:[%s2896_s2 + $0xd8] sm:$0xff]  ;;  %v71_v8 = vld [vmem:[%s2896_s2 + $0xa0] sm:$0xff] }
   0x4   :  { %90 = vmatpush.msra.mxu0 %v79_v1  ;;  %110 = vmatpush.msra.mxu1 %v80_v6  ;;  %v76_v9 = vld [vmem:[%s2896_s2 + $0xc8] sm:$0xff]  ;;  %v69_v10 = vld [vmem:[%s2896_s2 + $0x90] sm:$0xff]  ;;  %v74_v11 = vld [vmem:[%s2896_s2 + $0xb8] sm:$0xff] }
   0x5   :  { %v145_v12 = vld [vmem:[%s2898_s4 + $0x78] sm:$0xff]  ;;  %v67_v13 = vld [vmem:[%s2896_s2 + $0x80] sm:$0xff]  ;;  %v144_v14 = vld [vmem:[%s2898_s4 + $0x70] sm:$0xff] }
   0x6   :  { %91 = vmatpush.msra.mxu0 %v77_v2  ;;  %111 = vmatpush.msra.mxu1 %v78_v7  ;;  %v72_v15 = vld [vmem:[%s2896_s2 + $0xa8] sm:$0xff]  ;;  %v65_v17 = vld [vmem:[%s2896_s2 + $0x70] sm:$0xff]  ;;  %v63_v18 = vld [vmem:[%s2896_s2 + $0x60] sm:$0xff] }
   0x7   :  { %150 = vmatpush.msra.mxu2 %v145_v12  ;;  %v143_v16 = vld [vmem:[%s2898_s4 + $0x68] sm:$0xff]  ;;  %v70_v19 = vld [vmem:[%s2896_s2 + $0x98] sm:$0xff]  ;;  %v142_v21 = vld [vmem:[%s2898_s4 + $0x60] sm:$0xff] }
   0x8   :  { %92 = vmatpush.msra.mxu0 %v75_v3  ;;  %112 = vmatpush.msra.mxu1 %v76_v9  ;;  %v68_v20 = vld [vmem:[%s2896_s2 + $0x88] sm:$0xff]  ;;  %v61_v22 = vld [vmem:[%s2896_s2 + $0x50] sm:$0xff]  ;;  %v141_v23 = vld [vmem:[%s2898_s4 + $0x58] sm:$0xff] }
   0x9   :  { %151 = vmatpush.msra.mxu2 %v144_v14  ;;  %v66_v24 = vld [vmem:[%s2896_s2 + $0x78] sm:$0xff]  ;;  %v140_v25 = vld [vmem:[%s2898_s4 + $0x50] sm:$0xff]  ;;  %v59_v26 = vld [vmem:[%s2896_s2 + $0x40] sm:$0xff] }
   0xa   :  { %93 = vmatpush.msra.mxu0 %v73_v5  ;;  %113 = vmatpush.msra.mxu1 %v74_v11  ;;  %v64_v27 = vld [vmem:[%s2896_s2 + $0x68] sm:$0xff] }
   0xb   :  { %152 = vmatpush.msra.mxu2 %v143_v16  ;;  %v139_v28 = vld [vmem:[%s2898_s4 + $0x48] sm:$0xff] }
   0xc   :  { %94 = vmatpush.msra.mxu0 %v71_v8  ;;  %114 = vmatpush.msra.mxu1 %v72_v15 }
   0xd   :  { %153 = vmatpush.msra.mxu2 %v142_v21 }
   0xe   :  { %95 = vmatpush.msra.mxu0 %v69_v10  ;;  %115 = vmatpush.msra.mxu1 %v70_v19 }
   0xf   :  { %154 = vmatpush.msra.mxu2 %v141_v23 }
  0x10   :  { %96 = vmatpush.msra.mxu0 %v67_v13  ;;  %116 = vmatpush.msra.mxu1 %v68_v20 }
  0x12   :  { %97 = vmatpush.msra.mxu0 %v65_v17 }
  0x14   :  { %98 = vmatpush.msra.mxu0 %v63_v18 }
  0x16   :  { %99 = vmatpush.msra.mxu0 %v61_v22 }
  0x17   :  { %19 = vsyncpa [#allocation3], 0  ;;  %v57_v29 = vld [vmem:[%s2896_s2 + $0x30] sm:$0xff]  ;;  %117 = vmatpush.msra.mxu1 %v66_v24  ;;  %155 = vmatpush.msra.mxu2 %v140_v25  ;;  %v62_v30 = vld [vmem:[%s2896_s2 + $0x58] sm:$0xff]  ;;  %s1533_s25 = smov [#allocation2]  }
  0x18   :  { %100 = vmatpush.msra.mxu0 %v59_v26  ;;  %v138_v31 = vld [vmem:[%s2898_s4 + $0x40] sm:$0xff]  ;;  %v60_v35 = vld [vmem:[%s2896_s2 + $0x48] sm:$0xff]  ;;  %v137_v36 = vld [vmem:[%s2898_s4 + $0x38] sm:$0xff] }
  0x19   :  { %v55_v32 = vld [vmem:[%s2896_s2 + $0x20] sm:$0xff]  ;;  %118 = vmatpush.msra.mxu1 %v64_v27  ;;  %156 = vmatpush.msra.mxu2 %v139_v28  ;;  %v53_v37 = vld [vmem:[%s2896_s2 + $0x10] sm:$0xff]  ;;  %v58_v38 = vld [vmem:[%s2896_s2 + $0x38] sm:$0xff] }
  0x1a   :  { %v1463_v33 = vld [vmem:[%s2895_s1] ss:$0 sm:$0xff]  ;;  %101 = vmatpush.msra.mxu0 %v57_v29  ;;  %v136_v39 = vld [vmem:[%s2898_s4 + $0x30] sm:$0xff]  ;;  %v56_v42 = vld [vmem:[%s2896_s2 + $0x28] sm:$0xff] }
  0x1b   :  { %v1709_v34 = vld [vmem:[%s2894_s0] sm:$0xff]  ;;  %119 = vmatpush.msra.mxu1 %v62_v30  ;;  %157 = vmatpush.msra.mxu2 %v138_v31  ;;  %v135_v43 = vld [vmem:[%s2898_s4 + $0x28] sm:$0xff]  ;;  %v54_v44 = vld [vmem:[%s2896_s2 + $0x18] sm:$0xff] }
  0x1c   :  { %102 = vmatpush.msra.mxu0 %v55_v32  ;;  %v51_v40 = vld [vmem:[%s2896_s2] sm:$0xff]  ;;  %v1730_v41 = vmul.f32 %v1463_v33, %v1709_v34  ;;  %v52_v45 = vld [vmem:[%s2896_s2 + $0x8] sm:$0xff]  ;;  %v133_v47 = vld [vmem:[%s2898_s4 + $0x18] sm:$0xff] }
  0x1d   :  { %120 = vmatpush.msra.mxu1 %v60_v35  ;;  %158 = vmatpush.msra.mxu2 %v137_v36  ;;  %v134_v46 = vld [vmem:[%s2898_s4 + $0x20] sm:$0xff]  ;;  %v227_v48 = vld [vmem:[%s2902_s8 + $0x78] sm:$0xff]  ;;  %v132_v49 = vld [vmem:[%s2898_s4 + $0x10] sm:$0xff] }
  0x1e   :  { %103 = vmatpush.msra.mxu0 %v53_v37  ;;  %v226_v50 = vld [vmem:[%s2902_s8 + $0x70] sm:$0xff]  ;;  %v131_v51 = vld [vmem:[%s2898_s4 + $0x8] sm:$0xff]  ;;  %v130_v53 = vld [vmem:[%s2898_s4] sm:$0xff] }
  0x1f   :  { %121 = vmatpush.msra.mxu1 %v58_v38  ;;  %159 = vmatpush.msra.mxu2 %v136_v39  ;;  %v225_v52 = vld [vmem:[%s2902_s8 + $0x68] sm:$0xff]  ;;  %v224_v54 = vld [vmem:[%s2902_s8 + $0x60] sm:$0xff]  ;;  %v223_v55 = vld [vmem:[%s2902_s8 + $0x58] sm:$0xff] }
  0x20   :  { %104 = vmatpush.msra.mxu0 %v51_v40  ;;  %v222_v56 = vld [vmem:[%s2902_s8 + $0x50] sm:$0xff]  ;;  %v221_v57 = vld [vmem:[%s2902_s8 + $0x48] sm:$0xff]  ;;  %v220_v58 = vld [vmem:[%s2902_s8 + $0x40] sm:$0xff] }
  0x21   :  { %105 = vmatmul.f32.vlgmr.msra.gmra.mxu0 %v1730_v41  ;;  %122 = vmatpush.msra.mxu1 %v56_v42  ;;  %v186_v59 = vld [vmem:[%s2900_s6 + $0x78] sm:$0xff]  ;;  %v185_v60 = vld [vmem:[%s2900_s6 + $0x70] sm:$0xff]  ;;  %v184_v62 = vld [vmem:[%s2900_s6 + $0x68] sm:$0xff] }
  0x22   :  { %160 = vmatpush.msra.mxu2 %v135_v43  ;;  %232 = vmatpush.msrb.mxu0 %v227_v48  ;;  %v219_v61 = vld [vmem:[%s2902_s8 + $0x38] sm:$0xff]  ;;  %v267_v0 = vld [vmem:[%s2904_s10 + $0x70] sm:$0xff]  ;;  %v183_v2 = vld [vmem:[%s2900_s6 + $0x60] sm:$0xff] }
  0x23   :  { %123 = vmatpush.msra.mxu1 %v54_v44  ;;  %191 = vmatpush.msra.mxu3 %v186_v59  ;;  %v268_v63 = vld [vmem:[%s2904_s10 + $0x78] sm:$0xff]  ;;  %v218_v1 = vld [vmem:[%s2902_s8 + $0x30] sm:$0xff]  ;;  %v266_v3 = vld [vmem:[%s2904_s10 + $0x68] sm:$0xff] }
  0x24   :  { %161 = vmatpush.msra.mxu2 %v134_v46  ;;  %233 = vmatpush.msrb.mxu0 %v226_v50  ;;  %v217_v4 = vld [vmem:[%s2902_s8 + $0x28] sm:$0xff]  ;;  %v182_v5 = vld [vmem:[%s2900_s6 + $0x58] sm:$0xff]  ;;  %v265_v6 = vld [vmem:[%s2904_s10 + $0x60] sm:$0xff] }
  0x25   :  { %124 = vmatpush.msra.mxu1 %v52_v45  ;;  %192 = vmatpush.msra.mxu3 %v185_v60  ;;  %v216_v7 = vld [vmem:[%s2902_s8 + $0x20] sm:$0xff]  ;;  %v181_v8 = vld [vmem:[%s2900_s6 + $0x50] sm:$0xff]  ;;  %v215_v9 = vld [vmem:[%s2902_s8 + $0x18] sm:$0xff] }
  0x26   :  { %125 = vmatmul.f32.vlgmr.msra.gmra.mxu1 %v1730_v41  ;;  %162 = vmatpush.msra.mxu2 %v133_v47  ;;  %v180_v10 = vld [vmem:[%s2900_s6 + $0x48] sm:$0xff]  ;;  %v83_v11 = vld [vmem:[%s2897_s3] sm:$0x3]  ;;  %v214_v12 = vld [vmem:[%s2902_s8 + $0x10] sm:$0xff] }
  0x27   :  { %234 = vmatpush.msrb.mxu0 %v225_v52  ;;  %273 = vmatpush.msrb.mxu1 %v268_v63  ;;  %v179_v13 = vld [vmem:[%s2900_s6 + $0x40] sm:$0xff]  ;;  %v213_v14 = vld [vmem:[%s2902_s8 + $0x8] sm:$0xff]  ;;  %v178_v15 = vld [vmem:[%s2900_s6 + $0x38] sm:$0xff]  ;;  %v85_v16 = vperm.slane %v83_v11, 0  ;;  %v86_v22 = vperm.slane %v83_v11, 1 }
  0x28   :  { %163 = vmatpush.msra.mxu2 %v132_v49  ;;  %193 = vmatpush.msra.mxu3 %v184_v62  ;;  %v212_v17 = vld [vmem:[%s2902_s8] sm:$0xff]  ;;  %v177_v18 = vld [vmem:[%s2900_s6 + $0x30] sm:$0xff]  ;;  %v176_v20 = vld [vmem:[%s2900_s6 + $0x28] sm:$0xff] }
  0x29   :  { %235 = vmatpush.msrb.mxu0 %v224_v54  ;;  %274 = vmatpush.msrb.mxu1 %v267_v0  ;;  %v264_v27 = vld [vmem:[%s2904_s10 + $0x58] sm:$0xff]  ;;  %v175_v28 = vld [vmem:[%s2900_s6 + $0x20] sm:$0xff]  ;;  %v263_v29 = vld [vmem:[%s2904_s10 + $0x50] sm:$0xff] }
  0x2a   :  { %164 = vmatpush.msra.mxu2 %v131_v51  ;;  %194 = vmatpush.msra.mxu3 %v183_v2  ;;  %v174_v30 = vld [vmem:[%s2900_s6 + $0x18] sm:$0xff]  ;;  %v262_v31 = vld [vmem:[%s2904_s10 + $0x48] sm:$0xff]  ;;  %v173_v32 = vld [vmem:[%s2900_s6 + $0x10] sm:$0xff] }
  0x2b   :  { %236 = vmatpush.msrb.mxu0 %v223_v55  ;;  %275 = vmatpush.msrb.mxu1 %v266_v3  ;;  %v261_v33 = vld [vmem:[%s2904_s10 + $0x40] sm:$0xff]  ;;  %v172_v35 = vld [vmem:[%s2900_s6 + $0x8] sm:$0xff]  ;;  %v260_v36 = vld [vmem:[%s2904_s10 + $0x38] sm:$0xff] }
  0x2c   :  { %165 = vmatpush.msra.mxu2 %v130_v53  ;;  %195 = vmatpush.msra.mxu3 %v182_v5  ;;  %v171_v37 = vld [vmem:[%s2900_s6] sm:$0xff]  ;;  %v259_v38 = vld [vmem:[%s2904_s10 + $0x30] sm:$0xff]  ;;  %v258_v39 = vld [vmem:[%s2904_s10 + $0x28] sm:$0xff] }
  0x2d   :  { %237 = vmatpush.msrb.mxu0 %v222_v56  ;;  %276 = vmatpush.msrb.mxu1 %v265_v6  ;;  %v257_v40 = vld [vmem:[%s2904_s10 + $0x20] sm:$0xff]  ;;  %v1187_v42 = vld [vmem:[%s2896_s2 + $0x1f0] sm:$0xff]  ;;  %v1188_v43 = vld [vmem:[%s2896_s2 + $0x1f8] sm:$0xff] }
  0x2e   :  { %196 = vmatpush.msra.mxu3 %v181_v8  ;;  %v256_v44 = vld [vmem:[%s2904_s10 + $0x18] sm:$0xff]  ;;  %356 = vmatpush.msrb.mxu2 %v1187_v42  ;;  %v1185_v45 = vld [vmem:[%s2896_s2 + $0x1e0] sm:$0xff]  ;;  %v1186_v46 = vld [vmem:[%s2896_s2 + $0x1e8] sm:$0xff] }
  0x2f   :  { %238 = vmatpush.msrb.mxu0 %v221_v57  ;;  %277 = vmatpush.msrb.mxu1 %v264_v27  ;;  %v1183_v47 = vld [vmem:[%s2896_s2 + $0x1d0] sm:$0xff]  ;;  %v1184_v48 = vld [vmem:[%s2896_s2 + $0x1d8] sm:$0xff]  ;;  %v1181_v50 = vld [vmem:[%s2896_s2 + $0x1c0] sm:$0xff] }
  0x30   :  { %197 = vmatpush.msra.mxu3 %v180_v10  ;;  %v255_v49 = vld [vmem:[%s2904_s10 + $0x10] sm:$0xff]  ;;  %357 = vmatpush.msrb.mxu2 %v1185_v45  ;;  %v1182_v51 = vld [vmem:[%s2896_s2 + $0x1c8] sm:$0xff]  ;;  %v1180_v54 = vld [vmem:[%s2896_s2 + $0x1b8] sm:$0xff] }
  0x31   :  { %239 = vmatpush.msrb.mxu0 %v220_v58  ;;  %278 = vmatpush.msrb.mxu1 %v263_v29  ;;  %v254_v52 = vld [vmem:[%s2904_s10 + $0x8] sm:$0xff]  ;;  %v1179_v53 = vld [vmem:[%s2896_s2 + $0x1b0] sm:$0xff]  ;;  %v253_v55 = vld [vmem:[%s2904_s10] sm:$0xff] }
  0x32   :  { %198 = vmatpush.msra.mxu3 %v179_v13  ;;  %358 = vmatpush.msrb.mxu2 %v1183_v47  ;;  %v1177_v56 = vld [vmem:[%s2896_s2 + $0x1a0] sm:$0xff]  ;;  %v1178_v57 = vld [vmem:[%s2896_s2 + $0x1a8] sm:$0xff]  ;;  %v1175_v2 = vld [vmem:[%s2896_s2 + $0x190] sm:$0xff] }
  0x33   :  { %240 = vmatpush.msrb.mxu0 %v219_v61  ;;  %279 = vmatpush.msrb.mxu1 %v262_v31  ;;  %v1465_v58 = vld [vmem:[%s2903_s9] ss:$0 sm:$0xff]  ;;  %v1176_v3 = vld [vmem:[%s2896_s2 + $0x198] sm:$0xff]  ;;  %v1174_v5 = vld [vmem:[%s2896_s2 + $0x188] sm:$0xff] }
  0x34   :  { %199 = vmatpush.msra.mxu3 %v178_v15  ;;  %359 = vmatpush.msrb.mxu2 %v1181_v50  ;;  %v1464_v61 = vld [vmem:[%s2899_s5] ss:$0 sm:$0xff]  ;;  %v1171_v6 = vld [vmem:[%s2896_s2 + $0x170] sm:$0xff]  ;;  %v1168_v11 = vld [vmem:[%s2896_s2 + $0x158] sm:$0xff] }
  0x35   :  { %241 = vmatpush.msrb.mxu0 %v218_v1  ;;  %280 = vmatpush.msrb.mxu1 %v261_v33  ;;  %v1169_v8 = vld [vmem:[%s2896_s2 + $0x160] sm:$0xff]  ;;  %v1167_v10 = vld [vmem:[%s2896_s2 + $0x150] sm:$0xff]  ;;  %v1166_v13 = vld [vmem:[%s2896_s2 + $0x148] sm:$0xff] }
  0x36   :  { %200 = vmatpush.msra.mxu3 %v177_v18  ;;  %360 = vmatpush.msrb.mxu2 %v1179_v53  ;;  %v1164_v15 = vld [vmem:[%s2896_s2 + $0x138] sm:$0xff]  ;;  %v1159_v18 = vld [vmem:[%s2896_s2 + $0x110] sm:$0xff]  ;;  %v1237_v27 = vld [vmem:[%s2902_s8 + $0xe8] sm:$0xff] }
  0x37   :  { %242 = vmatpush.msrb.mxu0 %v217_v4  ;;  %281 = vmatpush.msrb.mxu1 %v260_v36  ;;  %v1173_v4 = vld [vmem:[%s2896_s2 + $0x180] sm:$0xff]  ;;  %v1203_v29 = vld [vmem:[%s2898_s4 + $0xe8] sm:$0xff]  ;;  %v1234_v36 = vld [vmem:[%s2902_s8 + $0xd0] sm:$0xff] }
  0x38   :  { %201 = vmatpush.msra.mxu3 %v176_v20  ;;  %361 = vmatpush.msrb.mxu2 %v1177_v56  ;;  %v1157_v20 = vld [vmem:[%s2896_s2 + $0x100] sm:$0xff]  ;;  %v1231_v50 = vld [vmem:[%s2902_s8 + $0xb8] sm:$0xff]  ;;  %v1196_v56 = vld [vmem:[%s2898_s4 + $0xb0] sm:$0xff] }
  0x39   :  { %243 = vmatpush.msrb.mxu0 %v216_v7  ;;  %282 = vmatpush.msrb.mxu1 %v259_v38  ;;  %v1172_v7 = vld [vmem:[%s2896_s2 + $0x178] sm:$0xff]  ;;  %v1202_v31 = vld [vmem:[%s2898_s4 + $0xe0] sm:$0xff]  ;;  %v1200_v38 = vld [vmem:[%s2898_s4 + $0xd0] sm:$0xff] }
  0x3a   :  { %202 = vmatpush.msra.mxu3 %v175_v28  ;;  %362 = vmatpush.msrb.mxu2 %v1175_v2  ;;  %v1197_v53 = vld [vmem:[%s2898_s4 + $0xb8] sm:$0xff] }
  0x3b   :  { %244 = vmatpush.msrb.mxu0 %v215_v9  ;;  %283 = vmatpush.msrb.mxu1 %v258_v39  ;;  %v1170_v9 = vld [vmem:[%s2896_s2 + $0x168] sm:$0xff]  ;;  %v1467_v39 = vld [vmem:[%s2905_s11] ss:$0 sm:$0xff] }
  0x3c   :  { %203 = vmatpush.msra.mxu3 %v174_v30  ;;  %363 = vmatpush.msrb.mxu2 %v1173_v4  ;;  %v1236_v30 = vld [vmem:[%s2902_s8 + $0xe0] sm:$0xff]  ;;  %v1226_v4 = vld [vmem:[%s2902_s8 + $0x90] sm:$0xff] }
  0x3d   :  { %245 = vmatpush.msrb.mxu0 %v214_v12  ;;  %284 = vmatpush.msrb.mxu1 %v257_v40  ;;  %v1165_v12 = vld [vmem:[%s2896_s2 + $0x140] sm:$0xff]  ;;  %v1233_v40 = vld [vmem:[%s2902_s8 + $0xc8] sm:$0xff] }
  0x3e   :  { %204 = vmatpush.msra.mxu3 %v173_v32  ;;  %364 = vmatpush.msrb.mxu2 %v1171_v6  ;;  %v1235_v32 = vld [vmem:[%s2902_s8 + $0xd8] sm:$0xff] }
  0x3f   :  { %246 = vmatpush.msrb.mxu0 %v213_v14  ;;  %285 = vmatpush.msrb.mxu1 %v256_v44  ;;  %v1163_v14 = vld [vmem:[%s2896_s2 + $0x130] sm:$0xff]  ;;  %v1199_v44 = vld [vmem:[%s2898_s4 + $0xc8] sm:$0xff]  ;;  %v1193_v6 = vld [vmem:[%s2898_s4 + $0x98] sm:$0xff] }
  0x40   :  { %205 = vmatpush.msra.mxu3 %v172_v35  ;;  %365 = vmatpush.msrb.mxu2 %v1169_v8  ;;  %v1201_v35 = vld [vmem:[%s2898_s4 + $0xd8] sm:$0xff]  ;;  %v1192_v8 = vld [vmem:[%s2898_s4 + $0x90] sm:$0xff] }
  0x41   :  { %247 = vmatpush.msrb.mxu0 %v212_v17  ;;  %286 = vmatpush.msrb.mxu1 %v255_v49  ;;  %v1162_v17 = vld [vmem:[%s2896_s2 + $0x128] sm:$0xff] }
  0x42   :  { %206 = vmatpush.msra.mxu3 %v171_v37  ;;  %366 = vmatpush.msrb.mxu2 %v1167_v10  ;;  %v1466_v37 = vld [vmem:[%s2901_s7] ss:$0 sm:$0xff] }
  0x43   :  { %287 = vmatpush.msrb.mxu1 %v254_v52  ;;  %v1190_v10 = vld [vmem:[%s2898_s4 + $0x80] sm:$0xff] }
  0x44   :  { %376 = vmatpush.msrb.mxu3 %v1188_v43  ;;  %367 = vmatpush.msrb.mxu2 %v1165_v12  ;;  %v1255_v12 = vld [vmem:[%s2904_s10 + $0xf0] sm:$0xff] }
  0x45   :  { %288 = vmatpush.msrb.mxu1 %v253_v55 }
  0x46   :  { %377 = vmatpush.msrb.mxu3 %v1186_v46  ;;  %368 = vmatpush.msrb.mxu2 %v1163_v14  ;;  %v1232_v46 = vld [vmem:[%s2902_s8 + $0xc0] sm:$0xff]  ;;  %v1221_v14 = vld [vmem:[%s2900_s6 + $0xf0] sm:$0xff] }
  0x48   :  { %378 = vmatpush.msrb.mxu3 %v1184_v48  ;;  %v1198_v48 = vld [vmem:[%s2898_s4 + $0xc0] sm:$0xff] }
  0x4a   :  { %379 = vmatpush.msrb.mxu3 %v1182_v51 }
  0x4c   :  { %380 = vmatpush.msrb.mxu3 %v1180_v54  ;;  %v1230_v54 = vld [vmem:[%s2902_s8 + $0xb0] sm:$0xff] }
  0x4e   :  { %381 = vmatpush.msrb.mxu3 %v1178_v57 }
  0x50   :  { %382 = vmatpush.msrb.mxu3 %v1176_v3 }
  0x52   :  { %383 = vmatpush.msrb.mxu3 %v1174_v5  ;;  %v1194_v5 = vld [vmem:[%s2898_s4 + $0xa0] sm:$0xff] }
  0x54   :  { %384 = vmatpush.msrb.mxu3 %v1172_v7  ;;  %v1224_v7 = vld [vmem:[%s2902_s8 + $0x80] sm:$0xff] }
  0x56   :  { %385 = vmatpush.msrb.mxu3 %v1170_v9  ;;  %v1191_v9 = vld [vmem:[%s2898_s4 + $0x88] sm:$0xff] }
  0x58   :  { %386 = vmatpush.msrb.mxu3 %v1168_v11  ;;  %v1256_v11 = vld [vmem:[%s2904_s10 + $0xf8] sm:$0xff] }
  0x5a   :  { %387 = vmatpush.msrb.mxu3 %v1166_v13  ;;  %v1222_v13 = vld [vmem:[%s2900_s6 + $0xf8] sm:$0xff] }
  0x5b   :  { %462 = vmatpush.msra.mxu1 %v1222_v13  ;;  %v1275_v13 = vld [vmem:[%s2896_s2 + $0x280] sm:$0xff] }
  0x5c   :  { %388 = vmatpush.msrb.mxu3 %v1164_v15  ;;  %v1254_v15 = vld [vmem:[%s2904_s10 + $0xe8] sm:$0xff] }
  0x5d   :  { %463 = vmatpush.msra.mxu1 %v1221_v14  ;;  %v1276_v14 = vld [vmem:[%s2896_s2 + $0x288] sm:$0xff] }
  0x5e   :  { %389 = vmatpush.msrb.mxu3 %v1162_v17  ;;  %v1253_v17 = vld [vmem:[%s2904_s10 + $0xe0] sm:$0xff] }
  0x9e   :  { %v106_v19 = vpop.f32.mrf.mxu0 }
  0x9f   :  { %v107_v21 = vadd.f32 %v106_v19, %v85_v16  ;;  %v1161_v16 = vld [vmem:[%s2896_s2 + $0x120] sm:$0xff]  ;;  %v1160_v19 = vld [vmem:[%s2896_s2 + $0x118] sm:$0xff] }
  0xa0   :  { %369 = vmatpush.msrb.mxu2 %v1161_v16  ;;  %390 = vmatpush.msrb.mxu3 %v1160_v19  ;;  %v1220_v16 = vld [vmem:[%s2900_s6 + $0xe8] sm:$0xff]  ;;  %v1252_v19 = vld [vmem:[%s2904_s10 + $0xd8] sm:$0xff] }
  0xa1   :  { %1483 = vtanh.f32 %v107_v21  ;;  %v1158_v21 = vld [vmem:[%s2896_s2 + $0x108] sm:$0xff]  ;;  %464 = vmatpush.msra.mxu1 %v1220_v16  ;;  %v1274_v16 = vld [vmem:[%s2896_s2 + $0x278] sm:$0xff] }
  0xa2   :  { %370 = vmatpush.msrb.mxu2 %v1159_v18  ;;  %391 = vmatpush.msrb.mxu3 %v1158_v21  ;;  %v1219_v18 = vld [vmem:[%s2900_s6 + $0xe0] sm:$0xff]  ;;  %v1251_v21 = vld [vmem:[%s2904_s10 + $0xd0] sm:$0xff] }
  0xa3   :  { %v126_v23 = vpop.f32.mrf.mxu1  ;;  %465 = vmatpush.msra.mxu1 %v1219_v18  ;;  %v1272_v18 = vld [vmem:[%s2896_s2 + $0x268] sm:$0xff] }
  0xa4   :  { %v127_v24 = vadd.f32 %v126_v23, %v86_v22  ;;  %371 = vmatpush.msrb.mxu2 %v1157_v20  ;;  %v45_v22 = vld [vmem:[%s2895_s1] sm:$0x1]  ;;  %v1239_v23 = vld [vmem:[%s2902_s8 + $0xf8] sm:$0xff] }
  0xa5   :  { %v46_v28 = vsub.f32 1.0, %v45_v22  ;;  %v1218_v20 = vld [vmem:[%s2900_s6 + $0xd8] sm:$0xff]  ;;  %v1217_v22 = vld [vmem:[%s2900_s6 + $0xd0] sm:$0xff] }
  0xa6   :  { %v211_v25 = vmax.f32 %v127_v24, 0.0  ;;  %v1238_v24 = vld [vmem:[%s2902_s8 + $0xf0] sm:$0xff]  ;;  %466 = vmatpush.msra.mxu1 %v1218_v20  ;;  %v1270_v20 = vld [vmem:[%s2896_s2 + $0x258] sm:$0xff] }
  0xa7   :  { %v1484_v26 = vpop.eup %1483  ;;  %v303_v33 = vsub.f32 0.0, %v46_v28 }
  0xa8   :  { %166 = vmatmul.f32.vlgmr.msra.gmra.mxu2 %v1484_v26  ;;  %248 = vmatmul.f32.vlgmr.msrb.gmra.mxu0 %v211_v25  ;;  %v1205_v25 = vld [vmem:[%s2898_s4 + $0xf8] sm:$0xff]  ;;  %v1204_v26 = vld [vmem:[%s2898_s4 + $0xf0] sm:$0xff] }
  0xa9   :  { %505 = vmatpush.msra.mxu2 %v1239_v23  ;;  %419 = vmatpush.msra.mxu0 %v1205_v25  ;;  %v305_v42 = vperm.slane %v303_v33, 0  ;;  %v1250_v23 = vld [vmem:[%s2904_s10 + $0xc8] sm:$0xff]  ;;  %v1249_v25 = vld [vmem:[%s2904_s10 + $0xc0] sm:$0xff] }
  0xaa   :  { %467 = vmatpush.msra.mxu1 %v1217_v22  ;;  %v1212_v33 = vld [vmem:[%s2900_s6 + $0xa8] sm:$0xff] }
  0xab   :  { %506 = vmatpush.msra.mxu2 %v1238_v24  ;;  %420 = vmatpush.msra.mxu0 %v1204_v26  ;;  %v1216_v24 = vld [vmem:[%s2900_s6 + $0xc8] sm:$0xff]  ;;  %v1215_v26 = vld [vmem:[%s2900_s6 + $0xc0] sm:$0xff] }
  0xac   :  { %468 = vmatpush.msra.mxu1 %v1216_v24  ;;  %v1268_v22 = vld [vmem:[%s2896_s2 + $0x248] sm:$0xff]  ;;  %v1266_v24 = vld [vmem:[%s2896_s2 + $0x238] sm:$0xff] }
  0xad   :  { %507 = vmatpush.msra.mxu2 %v1237_v27  ;;  %421 = vmatpush.msra.mxu0 %v1203_v29  ;;  %v1248_v27 = vld [vmem:[%s2904_s10 + $0xb8] sm:$0xff]  ;;  %v1189_v29 = vld [vmem:[%s2897_s3 + $0x2] sm:$0x3] }
  0xae   :  { %469 = vmatpush.msra.mxu1 %v1215_v26  ;;  %v1264_v26 = vld [vmem:[%s2896_s2 + $0x228] sm:$0xff] }
  0xaf   :  { %508 = vmatpush.msra.mxu2 %v1236_v30  ;;  %422 = vmatpush.msra.mxu0 %v1202_v31  ;;  %v1247_v30 = vld [vmem:[%s2904_s10 + $0xb0] sm:$0xff] }
  0xb0   :  { %v1213_v31 = vld [vmem:[%s2900_s6 + $0xb0] sm:$0xff] }
  0xb1   :  { %509 = vmatpush.msra.mxu2 %v1235_v32  ;;  %423 = vmatpush.msra.mxu0 %v1201_v35  ;;  %v1246_v32 = vld [vmem:[%s2904_s10 + $0xa8] sm:$0xff]  ;;  %v352_v35 = vperm.slane %v1189_v29, 0 }
  0xb3   :  { %510 = vmatpush.msra.mxu2 %v1234_v36  ;;  %424 = vmatpush.msra.mxu0 %v1200_v38  ;;  %v353_v36 = vperm.slane %v1189_v29, 1  ;;  %v1259_v29 = vld [vmem:[%s2896_s2 + $0x200] sm:$0xff] }
  0xb5   :  { %511 = vmatpush.msra.mxu2 %v1233_v40  ;;  %425 = vmatpush.msra.mxu0 %v1199_v44  ;;  %v1244_v40 = vld [vmem:[%s2904_s10 + $0x98] sm:$0xff] }
  0xb7   :  { %512 = vmatpush.msra.mxu2 %v1232_v46  ;;  %426 = vmatpush.msra.mxu0 %v1198_v48  ;;  %v1211_v46 = vld [vmem:[%s2900_s6 + $0xa0] sm:$0xff]  ;;  %v1210_v48 = vld [vmem:[%s2900_s6 + $0x98] sm:$0xff] }
  0xb9   :  { %513 = vmatpush.msra.mxu2 %v1231_v50  ;;  %427 = vmatpush.msra.mxu0 %v1197_v53  ;;  %v1209_v50 = vld [vmem:[%s2900_s6 + $0x90] sm:$0xff]  ;;  %v1208_v53 = vld [vmem:[%s2900_s6 + $0x88] sm:$0xff] }
  0xbb   :  { %514 = vmatpush.msra.mxu2 %v1230_v54  ;;  %428 = vmatpush.msra.mxu0 %v1196_v56  ;;  %v1207_v54 = vld [vmem:[%s2900_s6 + $0x80] sm:$0xff]  ;;  %v1290_v56 = vld [vmem:[%s2896_s2 + $0x2f8] sm:$0xff] }
 0x125   :  { %v249_v59 = vpop.f32.mrf.mxu0 }
 0x126   :  { %v250_v60 = vadd.f32 %v1465_v58, %v249_v59  ;;  %v295_v58 = vperm.slane %v46_v28, 0  ;;  %v1229_v59 = vld [vmem:[%s2902_s8 + $0xa8] sm:$0xff]  ;;  %v1214_v28 = vld [vmem:[%s2900_s6 + $0xb8] sm:$0xff] }
 0x127   :  { %515 = vmatpush.msra.mxu2 %v1229_v59  ;;  %470 = vmatpush.msra.mxu1 %v1214_v28  ;;  %v1285_v59 = vld [vmem:[%s2896_s2 + $0x2d0] sm:$0xff]  ;;  %v1262_v28 = vld [vmem:[%s2896_s2 + $0x218] sm:$0xff] }
 0x128   :  { %v252_v62 = vmax.f32 %v250_v60, 0.0  ;;  %v1195_v60 = vld [vmem:[%s2898_s4 + $0xa8] sm:$0xff] }
 0x129   :  { %429 = vmatpush.msra.mxu0 %v1195_v60  ;;  %471 = vmatpush.msra.mxu1 %v1213_v31  ;;  %v1286_v60 = vld [vmem:[%s2896_s2 + $0x2d8] sm:$0xff]  ;;  %v1156_v31 = vld [vmem:[%s2895_s1 + $0x1] sm:$0x1] }
 0x12a   :  { %289 = vmatmul.f32.vlgmr.msrb.gmra.mxu1 %v252_v62 }
 0x12b   :  { %v167_v63 = vpop.f32.mrf.mxu2  ;;  %430 = vmatpush.msra.mxu0 %v1194_v5  ;;  %472 = vmatpush.msra.mxu1 %v1212_v33  ;;  %v1470_v5 = vld [vmem:[%s2903_s9 + $0x1] ss:$0 sm:$0xff]  ;;  %v1340_v33 = vld [vmem:[%s2902_s8 + $0x170] sm:$0xff] }
 0x12c   :  { %v168_v0 = vadd.f32 %v1464_v61, %v167_v63  ;;  %v1228_v61 = vld [vmem:[%s2902_s8 + $0xa0] sm:$0xff] }
 0x12d   :  { %516 = vmatpush.msra.mxu2 %v1228_v61  ;;  %431 = vmatpush.msra.mxu0 %v1193_v6  ;;  %v1283_v61 = vld [vmem:[%s2896_s2 + $0x2c0] sm:$0xff] }
 0x12e   :  { %1485 = vtanh.f32 %v168_v0  ;;  %473 = vmatpush.msra.mxu1 %v1211_v46  ;;  %v1336_v46 = vld [vmem:[%s2902_s8 + $0x150] sm:$0xff] }
 0x12f   :  { %432 = vmatpush.msra.mxu0 %v1192_v8 }
 0x130   :  { %474 = vmatpush.msra.mxu1 %v1210_v48  ;;  %v1302_v48 = vld [vmem:[%s2898_s4 + $0x150] sm:$0xff] }
 0x131   :  { %433 = vmatpush.msra.mxu0 %v1191_v9 }
 0x132   :  { %475 = vmatpush.msra.mxu1 %v1209_v50 }
 0x133   :  { %434 = vmatpush.msra.mxu0 %v1190_v10 }
 0x134   :  { %v1486_v1 = vpop.eup %1485  ;;  %476 = vmatpush.msra.mxu1 %v1208_v53 }
 0x135   :  { %207 = vmatmul.f32.vlgmr.msra.gmra.mxu3 %v1486_v1  ;;  %v1468_v1 = vld [vmem:[%s2895_s1 + $0x1] ss:$0 sm:$0xff] }
 0x136   :  { %548 = vmatpush.msra.mxu3 %v1256_v11  ;;  %477 = vmatpush.msra.mxu1 %v1207_v54  ;;  %v1277_v11 = vld [vmem:[%s2896_s2 + $0x290] sm:$0xff]  ;;  %v1472_v54 = vld [vmem:[%s2905_s11 + $0x1] ss:$0 sm:$0xff] }
 0x138   :  { %549 = vmatpush.msra.mxu3 %v1255_v12  ;;  %651 = vmatpush.msrb.mxu1 %v1290_v56  ;;  %v1278_v12 = vld [vmem:[%s2896_s2 + $0x298] sm:$0xff] }
 0x13a   :  { %550 = vmatpush.msra.mxu3 %v1254_v15  ;;  %v1273_v15 = vld [vmem:[%s2896_s2 + $0x270] sm:$0xff] }
 0x13c   :  { %551 = vmatpush.msra.mxu3 %v1253_v17  ;;  %v1271_v17 = vld [vmem:[%s2896_s2 + $0x260] sm:$0xff] }
 0x13e   :  { %552 = vmatpush.msra.mxu3 %v1252_v19  ;;  %v1269_v19 = vld [vmem:[%s2896_s2 + $0x250] sm:$0xff] }
 0x140   :  { %553 = vmatpush.msra.mxu3 %v1251_v21  ;;  %v1267_v21 = vld [vmem:[%s2896_s2 + $0x240] sm:$0xff] }
 0x142   :  { %554 = vmatpush.msra.mxu3 %v1250_v23  ;;  %v1265_v23 = vld [vmem:[%s2896_s2 + $0x230] sm:$0xff] }
 0x144   :  { %555 = vmatpush.msra.mxu3 %v1249_v25  ;;  %v1263_v25 = vld [vmem:[%s2896_s2 + $0x220] sm:$0xff] }
 0x146   :  { %556 = vmatpush.msra.mxu3 %v1248_v27  ;;  %v1261_v27 = vld [vmem:[%s2896_s2 + $0x210] sm:$0xff] }
 0x148   :  { %557 = vmatpush.msra.mxu3 %v1247_v30  ;;  %v1260_v30 = vld [vmem:[%s2896_s2 + $0x208] sm:$0xff] }
 0x14a   :  { %558 = vmatpush.msra.mxu3 %v1246_v32  ;;  %v1341_v32 = vld [vmem:[%s2902_s8 + $0x178] sm:$0xff] }
 0x1a7   :  { %v290_v43 = vpop.f32.mrf.mxu1 }
 0x1a8   :  { %v291_v49 = vadd.f32 %v1467_v39, %v290_v43 }
 0x1aa   :  { %v293_v57 = vsub.f32 %v1709_v34, %v291_v49  ;;  %v1227_v34 = vld [vmem:[%s2902_s8 + $0x98] sm:$0xff]  ;;  %v1242_v49 = vld [vmem:[%s2904_s10 + $0x88] sm:$0xff] }
 0x1ab   :  { %517 = vmatpush.msra.mxu2 %v1227_v34  ;;  %v1281_v34 = vld [vmem:[%s2896_s2 + $0x2b0] sm:$0xff] }
 0x1ac   :  { %v297_v62 = vmul.f32 %v295_v58, %v293_v57  ;;  %v1287_v57 = vld [vmem:[%s2896_s2 + $0x2e0] sm:$0xff]  ;;  %v1288_v58 = vld [vmem:[%s2896_s2 + $0x2e8] sm:$0xff] }
 0x1ad   :  { %518 = vmatpush.msra.mxu2 %v1226_v4  ;;  %652 = vmatpush.msrb.mxu1 %v1288_v58  ;;  %v1469_v4 = vld [vmem:[%s2899_s5 + $0x1] ss:$0 sm:$0xff] }
 0x1af   :  { %653 = vmatpush.msrb.mxu1 %v1286_v60 }
 0x1b8   :  { %v208_v45 = vpop.f32.mrf.mxu3 }
 0x1b9   :  { %v209_v47 = vadd.f32 %v1466_v37, %v208_v45  ;;  %v1245_v37 = vld [vmem:[%s2904_s10 + $0xa0] sm:$0xff] }
 0x1ba   :  { %559 = vmatpush.msra.mxu3 %v1245_v37  ;;  %v1339_v37 = vld [vmem:[%s2902_s8 + $0x168] sm:$0xff] }
 0x1bb   :  { %v298_v51 = vsub.f32 0.0, %v209_v47  ;;  %v2070_v52 = vmul.f32 %v305_v42, %v209_v47  ;;  %v1243_v47 = vld [vmem:[%s2904_s10 + $0x90] sm:$0xff] }
 0x1bc   :  { %560 = vmatpush.msra.mxu3 %v1244_v40  ;;  %v1338_v40 = vld [vmem:[%s2902_s8 + $0x160] sm:$0xff] }
 0x1bd   :  { %v299_v55 = vmul.f32 1.442695, %v298_v51  ;;  %v1241_v51 = vld [vmem:[%s2904_s10 + $0x80] sm:$0xff] }
 0x1be   :  { %561 = vmatpush.msra.mxu3 %v1243_v47  ;;  %v1471_v47 = vld [vmem:[%s2901_s7 + $0x1] ss:$0 sm:$0xff] }
 0x1bf   :  { %1487 = vpow2.f32 %v299_v55  ;;  %v1289_v55 = vld [vmem:[%s2896_s2 + $0x2f0] sm:$0xff] }
 0x1c0   :  { %562 = vmatpush.msra.mxu3 %v1242_v49  ;;  %631 = vmatpush.msrb.mxu0 %v1289_v55  ;;  %v1335_v49 = vld [vmem:[%s2902_s8 + $0x148] sm:$0xff]  ;;  %v1334_v55 = vld [vmem:[%s2902_s8 + $0x140] sm:$0xff] }
 0x1c2   :  { %563 = vmatpush.msra.mxu3 %v1241_v51  ;;  %632 = vmatpush.msrb.mxu0 %v1287_v57  ;;  %v1301_v51 = vld [vmem:[%s2898_s4 + $0x148] sm:$0xff]  ;;  %v1300_v57 = vld [vmem:[%s2898_s4 + $0x140] sm:$0xff] }
 0x1c4   :  { %633 = vmatpush.msrb.mxu0 %v1285_v59  ;;  %v1333_v59 = vld [vmem:[%s2902_s8 + $0x138] sm:$0xff] }
 0x1c5   :  { %v1488_v63 = vpop.eup %1487 }
 0x1c6   :  { %v301_v0 = vmul.f32 %v1488_v63, %v297_v62  ;;  %v1284_v62 = vld [vmem:[%s2896_s2 + $0x2c8] sm:$0xff]  ;;  %v1282_v63 = vld [vmem:[%s2896_s2 + $0x2b8] sm:$0xff]  ;;  %634 = vmatpush.msrb.mxu0 %v1283_v61 }
 0x1c7   :  { %654 = vmatpush.msrb.mxu1 %v1284_v62  ;;  %v1299_v62 = vld [vmem:[%s2898_s4 + $0x138] sm:$0xff] }
 0x1c8   :  { %v2098_v2 = vadd.f32 %v301_v0, %v1730_v41  ;;  %v1225_v41 = vld [vmem:[%s2902_s8 + $0x88] sm:$0xff]  ;;  %v1279_v0 = vld [vmem:[%s2896_s2 + $0x2a0] sm:$0xff]  ;;  %635 = vmatpush.msrb.mxu0 %v1281_v34 }
 0x1c9   :  { %519 = vmatpush.msra.mxu2 %v1225_v41  ;;  %655 = vmatpush.msrb.mxu1 %v1282_v63  ;;  %v1332_v63 = vld [vmem:[%s2902_s8 + $0x130] sm:$0xff] }
 0x1ca   :  { %v2101_v3 = vmul.f32 %v1468_v1, %v2098_v2  ;;  %v1280_v1 = vld [vmem:[%s2896_s2 + $0x2a8] sm:$0xff]  ;;  %636 = vmatpush.msrb.mxu0 %v1279_v0 }
 0x1cb   :  { %520 = vmatpush.msra.mxu2 %v1224_v7  ;;  %656 = vmatpush.msrb.mxu1 %v1280_v1 }
 0x1cc   :  { %372 = vmatmul.f32.vlgmr.msrb.gmra.mxu2 %v2101_v3  ;;  %392 = vmatmul.f32.vlgmr.msrb.gmra.mxu3 %v2101_v3 }
 0x1cd   :  { %637 = vmatpush.msrb.mxu0 %v1277_v11  ;;  %657 = vmatpush.msrb.mxu1 %v1278_v12 }
 0x1cf   :  { %638 = vmatpush.msrb.mxu0 %v1275_v13  ;;  %658 = vmatpush.msrb.mxu1 %v1276_v14  ;;  %v1328_v14 = vld [vmem:[%s2902_s8 + $0x110] sm:$0xff] }
 0x1d1   :  { %639 = vmatpush.msrb.mxu0 %v1273_v15  ;;  %659 = vmatpush.msrb.mxu1 %v1274_v16  ;;  %v1296_v15 = vld [vmem:[%s2898_s4 + $0x120] sm:$0xff]  ;;  %v1295_v16 = vld [vmem:[%s2898_s4 + $0x118] sm:$0xff] }
 0x1d3   :  { %640 = vmatpush.msrb.mxu0 %v1271_v17  ;;  %660 = vmatpush.msrb.mxu1 %v1272_v18  ;;  %v1326_v17 = vld [vmem:[%s2902_s8 + $0x100] sm:$0xff]  ;;  %v1294_v18 = vld [vmem:[%s2898_s4 + $0x110] sm:$0xff] }
 0x1d5   :  { %641 = vmatpush.msrb.mxu0 %v1269_v19  ;;  %661 = vmatpush.msrb.mxu1 %v1270_v20  ;;  %v1293_v19 = vld [vmem:[%s2898_s4 + $0x108] sm:$0xff]  ;;  %v1292_v20 = vld [vmem:[%s2898_s4 + $0x100] sm:$0xff] }
 0x1d7   :  { %642 = vmatpush.msrb.mxu0 %v1267_v21  ;;  %662 = vmatpush.msrb.mxu1 %v1268_v22  ;;  %v1358_v21 = vld [vmem:[%s2904_s10 + $0x178] sm:$0xff]  ;;  %v1357_v22 = vld [vmem:[%s2904_s10 + $0x170] sm:$0xff] }
 0x1d9   :  { %643 = vmatpush.msrb.mxu0 %v1265_v23  ;;  %663 = vmatpush.msrb.mxu1 %v1266_v24  ;;  %v1356_v23 = vld [vmem:[%s2904_s10 + $0x168] sm:$0xff]  ;;  %v1324_v24 = vld [vmem:[%s2900_s6 + $0x178] sm:$0xff] }
 0x1da   :  { %737 = vmatpush.msrb.mxu3 %v1324_v24  ;;  %v1378_v24 = vld [vmem:[%s2896_s2 + $0x388] sm:$0xff] }
 0x1db   :  { %644 = vmatpush.msrb.mxu0 %v1263_v25  ;;  %664 = vmatpush.msrb.mxu1 %v1264_v26  ;;  %v1323_v25 = vld [vmem:[%s2900_s6 + $0x170] sm:$0xff]  ;;  %v1355_v26 = vld [vmem:[%s2904_s10 + $0x160] sm:$0xff] }
 0x1dc   :  { %738 = vmatpush.msrb.mxu3 %v1323_v25  ;;  %v1375_v25 = vld [vmem:[%s2896_s2 + $0x370] sm:$0xff] }
 0x1dd   :  { %645 = vmatpush.msrb.mxu0 %v1261_v27  ;;  %665 = vmatpush.msrb.mxu1 %v1262_v28  ;;  %v1322_v27 = vld [vmem:[%s2900_s6 + $0x168] sm:$0xff]  ;;  %v1354_v28 = vld [vmem:[%s2904_s10 + $0x158] sm:$0xff] }
 0x1de   :  { %739 = vmatpush.msrb.mxu3 %v1322_v27  ;;  %v1373_v27 = vld [vmem:[%s2896_s2 + $0x360] sm:$0xff] }
 0x1df   :  { %646 = vmatpush.msrb.mxu0 %v1259_v29  ;;  %666 = vmatpush.msrb.mxu1 %v1260_v30  ;;  %v1321_v29 = vld [vmem:[%s2900_s6 + $0x160] sm:$0xff]  ;;  %v1353_v30 = vld [vmem:[%s2904_s10 + $0x150] sm:$0xff] }
 0x1e0   :  { %740 = vmatpush.msrb.mxu3 %v1321_v29  ;;  %v1371_v29 = vld [vmem:[%s2896_s2 + $0x350] sm:$0xff] }
 0x24f   :  { %v373_v38 = vpop.f32.mrf.mxu2  ;;  %v393_v39 = vpop.f32.mrf.mxu3 }
 0x250   :  { %v374_v42 = vadd.f32 %v373_v38, %v352_v35  ;;  %v394_v43 = vadd.f32 %v393_v39, %v353_v36  ;;  %v1307_v35 = vld [vmem:[%s2898_s4 + $0x178] sm:$0xff]  ;;  %v1306_v36 = vld [vmem:[%s2898_s4 + $0x170] sm:$0xff]  ;;  %v311_v38 = vsub.f32 1.0, %v1156_v31  ;;  %v1305_v39 = vld [vmem:[%s2898_s4 + $0x168] sm:$0xff] }
 0x251   :  { %694 = vmatpush.msrb.mxu2 %v1307_v35  ;;  %v1320_v31 = vld [vmem:[%s2900_s6 + $0x158] sm:$0xff]  ;;  %v1351_v35 = vld [vmem:[%s2904_s10 + $0x140] sm:$0xff] }
 0x252   :  { %1489 = vtanh.f32 %v374_v42  ;;  %v482_v44 = vmax.f32 %v394_v43, 0.0  ;;  %v1304_v42 = vld [vmem:[%s2898_s4 + $0x160] sm:$0xff]  ;;  %v1337_v43 = vld [vmem:[%s2902_s8 + $0x158] sm:$0xff]  ;;  %741 = vmatpush.msrb.mxu3 %v1320_v31 }
 0x253   :  { %695 = vmatpush.msrb.mxu2 %v1306_v36  ;;  %v1350_v36 = vld [vmem:[%s2904_s10 + $0x138] sm:$0xff]  ;;  %v1369_v31 = vld [vmem:[%s2896_s2 + $0x340] sm:$0xff] }
 0x254   :  { %521 = vmatmul.f32.vlgmr.msra.gmra.mxu2 %v482_v44  ;;  %v578_v44 = vsub.f32 0.0, %v311_v38 }
 0x255   :  { %696 = vmatpush.msrb.mxu2 %v1305_v39  ;;  %v1348_v39 = vld [vmem:[%s2904_s10 + $0x128] sm:$0xff] }
 0x256   :  { %v580_v50 = vperm.slane %v578_v44, 0 }
 0x257   :  { %697 = vmatpush.msrb.mxu2 %v1304_v42 }
 0x258   :  { %v1490_v45 = vpop.eup %1489 }
 0x259   :  { %435 = vmatmul.f32.vlgmr.msra.gmra.mxu0 %v1490_v45  ;;  %v1303_v45 = vld [vmem:[%s2898_s4 + $0x158] sm:$0xff] }
 0x25a   :  { %780 = vmatpush.msra.mxu0 %v1341_v32  ;;  %698 = vmatpush.msrb.mxu2 %v1303_v45  ;;  %v1352_v32 = vld [vmem:[%s2904_s10 + $0x148] sm:$0xff] }
 0x25c   :  { %781 = vmatpush.msra.mxu0 %v1340_v33  ;;  %699 = vmatpush.msrb.mxu2 %v1302_v48  ;;  %v1319_v33 = vld [vmem:[%s2900_s6 + $0x150] sm:$0xff] }
 0x25d   :  { %742 = vmatpush.msrb.mxu3 %v1319_v33  ;;  %v1367_v33 = vld [vmem:[%s2896_s2 + $0x330] sm:$0xff] }
 0x25e   :  { %782 = vmatpush.msra.mxu0 %v1339_v37  ;;  %700 = vmatpush.msrb.mxu2 %v1301_v51  ;;  %v1291_v37 = vld [vmem:[%s2897_s3 + $0x4] sm:$0x3]  ;;  %v1345_v51 = vld [vmem:[%s2904_s10 + $0x110] sm:$0xff] }
 0x25f   :  { %v628_v42 = vperm.slane %v1291_v37, 1 }
 0x260   :  { %783 = vmatpush.msra.mxu0 %v1338_v40  ;;  %701 = vmatpush.msrb.mxu2 %v1300_v57  ;;  %v627_v40 = vperm.slane %v1291_v37, 0  ;;  %v1316_v57 = vld [vmem:[%s2900_s6 + $0x138] sm:$0xff]  ;;  %v1366_v37 = vld [vmem:[%s2896_s2 + $0x328] sm:$0xff] }
 0x262   :  { %784 = vmatpush.msra.mxu0 %v1337_v43  ;;  %702 = vmatpush.msrb.mxu2 %v1299_v62  ;;  %v1347_v43 = vld [vmem:[%s2904_s10 + $0x120] sm:$0xff]  ;;  %v1311_v62 = vld [vmem:[%s2900_s6 + $0x110] sm:$0xff] }
 0x264   :  { %785 = vmatpush.msra.mxu0 %v1336_v46  ;;  %v1346_v46 = vld [vmem:[%s2904_s10 + $0x118] sm:$0xff] }
 0x266   :  { %786 = vmatpush.msra.mxu0 %v1335_v49 }
 0x268   :  { %787 = vmatpush.msra.mxu0 %v1334_v55  ;;  %v1317_v55 = vld [vmem:[%s2900_s6 + $0x140] sm:$0xff] }
 0x26a   :  { %788 = vmatpush.msra.mxu0 %v1333_v59  ;;  %v1314_v59 = vld [vmem:[%s2900_s6 + $0x128] sm:$0xff] }
 0x26c   :  { %789 = vmatpush.msra.mxu0 %v1332_v63  ;;  %v1309_v63 = vld [vmem:[%s2900_s6 + $0x100] sm:$0xff] }
 0x2d6   :  { %v436_v41 = vpop.f32.mrf.mxu0 }
 0x2d7   :  { %v437_v6 = vadd.f32 %v1469_v4, %v436_v41  ;;  %v522_v7 = vpop.f32.mrf.mxu2  ;;  %v1298_v4 = vld [vmem:[%s2898_s4 + $0x130] sm:$0xff]  ;;  %v1297_v41 = vld [vmem:[%s2898_s4 + $0x128] sm:$0xff] }
 0x2d8   :  { %v523_v8 = vadd.f32 %v1470_v5, %v522_v7  ;;  %v1331_v5 = vld [vmem:[%s2902_s8 + $0x128] sm:$0xff]  ;;  %v1330_v7 = vld [vmem:[%s2902_s8 + $0x120] sm:$0xff]  ;;  %703 = vmatpush.msrb.mxu2 %v1298_v4 }
 0x2d9   :  { %1491 = vtanh.f32 %v437_v6  ;;  %790 = vmatpush.msra.mxu0 %v1331_v5 }
 0x2da   :  { %v525_v9 = vmax.f32 %v523_v8, 0.0  ;;  %v1329_v8 = vld [vmem:[%s2902_s8 + $0x118] sm:$0xff]  ;;  %704 = vmatpush.msrb.mxu2 %v1297_v41 }
 0x2db   :  { %791 = vmatpush.msra.mxu0 %v1330_v7 }
 0x2dc   :  { %564 = vmatmul.f32.vlgmr.msra.gmra.mxu3 %v525_v9  ;;  %705 = vmatpush.msrb.mxu2 %v1296_v15  ;;  %v1388_v15 = vld [vmem:[%s2896_s2 + $0x3d8] sm:$0xff] }
 0x2dd   :  { %792 = vmatpush.msra.mxu0 %v1329_v8 }
 0x2de   :  { %706 = vmatpush.msrb.mxu2 %v1295_v16  ;;  %v1386_v16 = vld [vmem:[%s2896_s2 + $0x3c8] sm:$0xff] }
 0x2df   :  { %v1492_v10 = vpop.eup %1491  ;;  %793 = vmatpush.msra.mxu0 %v1328_v14  ;;  %v1387_v14 = vld [vmem:[%s2896_s2 + $0x3d0] sm:$0xff] }
 0x2e0   :  { %478 = vmatmul.f32.vlgmr.msra.gmra.mxu1 %v1492_v10  ;;  %707 = vmatpush.msrb.mxu2 %v1294_v18  ;;  %v1384_v18 = vld [vmem:[%s2896_s2 + $0x3b8] sm:$0xff] }
 0x2e1   :  { %823 = vmatpush.msra.mxu1 %v1358_v21  ;;  %v1379_v21 = vld [vmem:[%s2896_s2 + $0x390] sm:$0xff] }
 0x2e2   :  { %708 = vmatpush.msrb.mxu2 %v1293_v19  ;;  %v1381_v19 = vld [vmem:[%s2896_s2 + $0x3a0] sm:$0xff] }
 0x2e3   :  { %824 = vmatpush.msra.mxu1 %v1357_v22  ;;  %v1380_v22 = vld [vmem:[%s2896_s2 + $0x398] sm:$0xff] }
 0x2e4   :  { %709 = vmatpush.msrb.mxu2 %v1292_v20  ;;  %v1382_v20 = vld [vmem:[%s2896_s2 + $0x3a8] sm:$0xff] }
 0x2e5   :  { %825 = vmatpush.msra.mxu1 %v1356_v23  ;;  %v1377_v23 = vld [vmem:[%s2896_s2 + $0x380] sm:$0xff] }
 0x2e7   :  { %826 = vmatpush.msra.mxu1 %v1355_v26  ;;  %v1376_v26 = vld [vmem:[%s2896_s2 + $0x378] sm:$0xff] }
 0x2e9   :  { %827 = vmatpush.msra.mxu1 %v1354_v28  ;;  %v1374_v28 = vld [vmem:[%s2896_s2 + $0x368] sm:$0xff] }
 0x2eb   :  { %828 = vmatpush.msra.mxu1 %v1353_v30  ;;  %v1372_v30 = vld [vmem:[%s2896_s2 + $0x358] sm:$0xff] }
 0x2ed   :  { %829 = vmatpush.msra.mxu1 %v1352_v32  ;;  %v1370_v32 = vld [vmem:[%s2896_s2 + $0x348] sm:$0xff] }
 0x2ef   :  { %830 = vmatpush.msra.mxu1 %v1351_v35  ;;  %v1368_v35 = vld [vmem:[%s2896_s2 + $0x338] sm:$0xff] }
 0x2f1   :  { %831 = vmatpush.msra.mxu1 %v1350_v36  ;;  %v1365_v36 = vld [vmem:[%s2896_s2 + $0x320] sm:$0xff] }
 0x35d   :  { %v479_v53 = vpop.f32.mrf.mxu1 }
 0x35e   :  { %v480_v56 = vadd.f32 %v1471_v47, %v479_v53  ;;  %v1318_v53 = vld [vmem:[%s2900_s6 + $0x148] sm:$0xff] }
 0x35f   :  { %v565_v58 = vpop.f32.mrf.mxu3  ;;  %743 = vmatpush.msrb.mxu3 %v1318_v53  ;;  %v1406_v53 = vld [vmem:[%s2898_s4 + $0x1e0] sm:$0xff] }
 0x360   :  { %v573_v60 = vsub.f32 0.0, %v480_v56  ;;  %v582_v61 = vmul.f32 %v580_v50, %v480_v56  ;;  %v566_v34 = vadd.f32 %v1472_v54, %v565_v58  ;;  %v1344_v54 = vld [vmem:[%s2904_s10 + $0x108] sm:$0xff]  ;;  %v1343_v56 = vld [vmem:[%s2904_s10 + $0x100] sm:$0xff]  ;;  %v1315_v58 = vld [vmem:[%s2900_s6 + $0x130] sm:$0xff] }
 0x361   :  { %744 = vmatpush.msrb.mxu3 %v1317_v55 }
 0x362   :  { %v574_v0 = vmul.f32 1.442695, %v573_v60  ;;  %v2397_v1 = vadd.f32 %v582_v61, %v2070_v52  ;;  %v568_v6 = vsub.f32 %v2098_v2, %v566_v34  ;;  %v570_v52 = vperm.slane %v311_v38, 0  ;;  %v1473_v2 = vld [vmem:[%s2895_s1 + $0x2] ss:$0 sm:$0xff]  ;;  %v1349_v38 = vld [vmem:[%s2904_s10 + $0x130] sm:$0xff] }
 0x363   :  { %832 = vmatpush.msra.mxu1 %v1349_v38  ;;  %745 = vmatpush.msrb.mxu3 %v1316_v57  ;;  %v1313_v60 = vld [vmem:[%s2900_s6 + $0x120] sm:$0xff]  ;;  %v1312_v61 = vld [vmem:[%s2900_s6 + $0x118] sm:$0xff]  ;;  %v1310_v34 = vld [vmem:[%s2900_s6 + $0x108] sm:$0xff] }
 0x364   :  { %1493 = vpow2.f32 %v574_v0  ;;  %v572_v9 = vmul.f32 %v570_v52, %v568_v6  ;;  %v1474_v0 = vld [vmem:[%s2903_s9 + $0x2] ss:$0 sm:$0xff]  ;;  %v1363_v38 = vld [vmem:[%s2896_s2 + $0x310] sm:$0xff] }
 0x365   :  { %833 = vmatpush.msra.mxu1 %v1348_v39  ;;  %746 = vmatpush.msrb.mxu3 %v1315_v58  ;;  %v1475_v6 = vld [vmem:[%s2899_s5 + $0x2] ss:$0 sm:$0xff]  ;;  %v1364_v39 = vld [vmem:[%s2896_s2 + $0x318] sm:$0xff]  ;;  %v1438_v57 = vld [vmem:[%s2902_s8 + $0x1d0] sm:$0xff] }
 0x366   :  { %v1477_v58 = vld [vmem:[%s2901_s7 + $0x2] ss:$0 sm:$0xff] }
 0x367   :  { %834 = vmatpush.msra.mxu1 %v1347_v43  ;;  %747 = vmatpush.msrb.mxu3 %v1314_v59  ;;  %v1443_v43 = vld [vmem:[%s2902_s8 + $0x1f8] sm:$0xff]  ;;  %v1404_v59 = vld [vmem:[%s2898_s4 + $0x1d0] sm:$0xff] }
 0x369   :  { %835 = vmatpush.msra.mxu1 %v1346_v46  ;;  %748 = vmatpush.msrb.mxu3 %v1313_v60  ;;  %v1408_v46 = vld [vmem:[%s2898_s4 + $0x1f0] sm:$0xff]  ;;  %v1437_v60 = vld [vmem:[%s2902_s8 + $0x1c8] sm:$0xff] }
 0x36a   :  { %v1494_v10 = vpop.eup %1493 }
 0x36b   :  { %v576_v11 = vmul.f32 %v1494_v10, %v572_v9  ;;  %836 = vmatpush.msra.mxu1 %v1345_v51  ;;  %749 = vmatpush.msrb.mxu3 %v1312_v61  ;;  %v1391_v9 = vld [vmem:[%s2896_s2 + $0x3f0] sm:$0xff]  ;;  %v1392_v10 = vld [vmem:[%s2896_s2 + $0x3f8] sm:$0xff] }
 0x36c   :  { %906 = vmatpush.msra.mxu2 %v1391_v9 }
 0x36d   :  { %v2419_v12 = vadd.f32 %v576_v11, %v2101_v3  ;;  %v1327_v3 = vld [vmem:[%s2902_s8 + $0x108] sm:$0xff]  ;;  %837 = vmatpush.msra.mxu1 %v1344_v54  ;;  %750 = vmatpush.msrb.mxu3 %v1311_v62  ;;  %v1389_v11 = vld [vmem:[%s2896_s2 + $0x3e0] sm:$0xff]  ;;  %v1439_v54 = vld [vmem:[%s2902_s8 + $0x1d8] sm:$0xff] }
 0x36e   :  { %794 = vmatpush.msra.mxu0 %v1327_v3  ;;  %907 = vmatpush.msra.mxu2 %v1389_v11  ;;  %v1385_v3 = vld [vmem:[%s2896_s2 + $0x3c0] sm:$0xff]  ;;  %v1403_v62 = vld [vmem:[%s2898_s4 + $0x1c8] sm:$0xff] }
 0x36f   :  { %v2422_v13 = vmul.f32 %v1473_v2, %v2419_v12  ;;  %838 = vmatpush.msra.mxu1 %v1343_v56  ;;  %751 = vmatpush.msrb.mxu3 %v1310_v34  ;;  %v1390_v2 = vld [vmem:[%s2896_s2 + $0x3e8] sm:$0xff]  ;;  %v1405_v56 = vld [vmem:[%s2898_s4 + $0x1d8] sm:$0xff]  ;;  %v1476_v34 = vld [vmem:[%s2905_s11 + $0x2] ss:$0 sm:$0xff] }
 0x370   :  { %795 = vmatpush.msra.mxu0 %v1326_v17  ;;  %908 = vmatpush.msra.mxu2 %v1387_v14  ;;  %v1383_v17 = vld [vmem:[%s2896_s2 + $0x3b0] sm:$0xff] }
 0x371   :  { %647 = vmatmul.f32.vlgmr.msrb.gmra.mxu0 %v2422_v13  ;;  %667 = vmatmul.f32.vlgmr.msrb.gmra.mxu1 %v2422_v13  ;;  %v1400_v14 = vld [vmem:[%s2898_s4 + $0x1b0] sm:$0xff] }
 0x372   :  { %752 = vmatpush.msrb.mxu3 %v1309_v63  ;;  %909 = vmatpush.msra.mxu2 %v1385_v3  ;;  %v1399_v3 = vld [vmem:[%s2898_s4 + $0x1a8] sm:$0xff] }
 0x374   :  { %926 = vmatpush.msra.mxu3 %v1392_v10  ;;  %910 = vmatpush.msra.mxu2 %v1383_v17  ;;  %v1434_v10 = vld [vmem:[%s2902_s8 + $0x1b0] sm:$0xff]  ;;  %v1432_v17 = vld [vmem:[%s2902_s8 + $0x1a0] sm:$0xff] }
 0x376   :  { %927 = vmatpush.msra.mxu3 %v1390_v2  ;;  %911 = vmatpush.msra.mxu2 %v1381_v19 }
 0x378   :  { %928 = vmatpush.msra.mxu3 %v1388_v15  ;;  %912 = vmatpush.msra.mxu2 %v1379_v21  ;;  %v1433_v15 = vld [vmem:[%s2902_s8 + $0x1a8] sm:$0xff] }
 0x37a   :  { %929 = vmatpush.msra.mxu3 %v1386_v16  ;;  %913 = vmatpush.msra.mxu2 %v1377_v23 }
 0x37c   :  { %930 = vmatpush.msra.mxu3 %v1384_v18  ;;  %914 = vmatpush.msra.mxu2 %v1375_v25  ;;  %v1431_v18 = vld [vmem:[%s2902_s8 + $0x198] sm:$0xff]  ;;  %v1398_v25 = vld [vmem:[%s2898_s4 + $0x1a0] sm:$0xff] }
 0x37e   :  { %931 = vmatpush.msra.mxu3 %v1382_v20  ;;  %915 = vmatpush.msra.mxu2 %v1373_v27  ;;  %v1428_v27 = vld [vmem:[%s2902_s8 + $0x180] sm:$0xff] }
 0x380   :  { %932 = vmatpush.msra.mxu3 %v1380_v22  ;;  %916 = vmatpush.msra.mxu2 %v1371_v29  ;;  %v1395_v29 = vld [vmem:[%s2898_s4 + $0x188] sm:$0xff] }
 0x382   :  { %933 = vmatpush.msra.mxu3 %v1378_v24  ;;  %917 = vmatpush.msra.mxu2 %v1369_v31  ;;  %v1430_v24 = vld [vmem:[%s2902_s8 + $0x190] sm:$0xff]  ;;  %v1460_v31 = vld [vmem:[%s2904_s10 + $0x1f8] sm:$0xff] }
 0x384   :  { %934 = vmatpush.msra.mxu3 %v1376_v26  ;;  %918 = vmatpush.msra.mxu2 %v1367_v33  ;;  %v1397_v26 = vld [vmem:[%s2898_s4 + $0x198] sm:$0xff] }
 0x385   :  { %v1426_v33 = vld [vmem:[%s2900_s6 + $0x1f8] sm:$0xff] }
 0x386   :  { %935 = vmatpush.msra.mxu3 %v1374_v28  ;;  %919 = vmatpush.msra.mxu2 %v1365_v36  ;;  %v1396_v28 = vld [vmem:[%s2898_s4 + $0x190] sm:$0xff]  ;;  %v1458_v36 = vld [vmem:[%s2904_s10 + $0x1e8] sm:$0xff] }
 0x387   :  { %1012 = vmatpush.msrb.mxu1 %v1426_v33 }
 0x388   :  { %936 = vmatpush.msra.mxu3 %v1372_v30  ;;  %920 = vmatpush.msra.mxu2 %v1363_v38  ;;  %v1394_v30 = vld [vmem:[%s2898_s4 + $0x180] sm:$0xff] }
 0x389   :  { %v1457_v38 = vld [vmem:[%s2904_s10 + $0x1e0] sm:$0xff] }
 0x38a   :  { %937 = vmatpush.msra.mxu3 %v1370_v32  ;;  %v1459_v32 = vld [vmem:[%s2904_s10 + $0x1f0] sm:$0xff] }
 0x38c   :  { %938 = vmatpush.msra.mxu3 %v1368_v35  ;;  %v1425_v35 = vld [vmem:[%s2900_s6 + $0x1f0] sm:$0xff] }
 0x38d   :  { %1013 = vmatpush.msrb.mxu1 %v1425_v35 }
 0x38e   :  { %939 = vmatpush.msra.mxu3 %v1366_v37  ;;  %v1424_v37 = vld [vmem:[%s2900_s6 + $0x1e8] sm:$0xff] }
 0x38f   :  { %1014 = vmatpush.msrb.mxu1 %v1424_v37 }
 0x390   :  { %940 = vmatpush.msra.mxu3 %v1364_v39  ;;  %v1423_v39 = vld [vmem:[%s2900_s6 + $0x1e0] sm:$0xff] }
 0x391   :  { %1015 = vmatpush.msrb.mxu1 %v1423_v39 }
 0x3ee   :  { %v648_v44 = vpop.f32.mrf.mxu0  ;;  %v668_v45 = vpop.f32.mrf.mxu1 }
 0x3ef   :  { %v649_v47 = vadd.f32 %v648_v44, %v627_v40  ;;  %v669_v48 = vadd.f32 %v668_v45, %v628_v42  ;;  %v1361_v40 = vld [vmem:[%s2896_s2 + $0x300] sm:$0xff]  ;;  %v1362_v42 = vld [vmem:[%s2896_s2 + $0x308] sm:$0xff]  ;;  %v1442_v44 = vld [vmem:[%s2902_s8 + $0x1f0] sm:$0xff] }
 0x3f0   :  { %921 = vmatpush.msra.mxu2 %v1361_v40  ;;  %941 = vmatpush.msra.mxu3 %v1362_v42  ;;  %v1409_v45 = vld [vmem:[%s2898_s4 + $0x1f8] sm:$0xff] }
 0x3f1   :  { %1495 = vtanh.f32 %v649_v47  ;;  %v757_v49 = vmax.f32 %v669_v48, 0.0  ;;  %v1258_v47 = vld [vmem:[%s2895_s1 + $0x2] sm:$0x1]  ;;  %v1441_v48 = vld [vmem:[%s2902_s8 + $0x1e8] sm:$0xff]  ;;  %969 = vmatpush.msrb.mxu0 %v1409_v45  ;;  %v1456_v40 = vld [vmem:[%s2904_s10 + $0x1d8] sm:$0xff] }
 0x3f2   :  { %v586_v51 = vsub.f32 1.0, %v1258_v47  ;;  %v1422_v42 = vld [vmem:[%s2900_s6 + $0x1d8] sm:$0xff]  ;;  %v1454_v45 = vld [vmem:[%s2904_s10 + $0x1c8] sm:$0xff]  ;;  %v1453_v47 = vld [vmem:[%s2904_s10 + $0x1c0] sm:$0xff] }
 0x3f3   :  { %796 = vmatmul.f32.vlgmr.msra.gmra.mxu0 %v757_v49  ;;  %v1407_v49 = vld [vmem:[%s2898_s4 + $0x1e8] sm:$0xff]  ;;  %1016 = vmatpush.msrb.mxu1 %v1422_v42 }
 0x3f4   :  { %970 = vmatpush.msrb.mxu0 %v1408_v46  ;;  %v853_v55 = vsub.f32 0.0, %v586_v51  ;;  %v1420_v46 = vld [vmem:[%s2900_s6 + $0x1c8] sm:$0xff] }
 0x3f6   :  { %971 = vmatpush.msrb.mxu0 %v1407_v49  ;;  %v855_v61 = vperm.slane %v853_v55, 0  ;;  %v1452_v49 = vld [vmem:[%s2904_s10 + $0x1b8] sm:$0xff]  ;;  %v1450_v55 = vld [vmem:[%s2904_s10 + $0x1a8] sm:$0xff] }
 0x3f7   :  { %v1496_v50 = vpop.eup %1495 }
 0x3f8   :  { %710 = vmatmul.f32.vlgmr.msrb.gmra.mxu2 %v1496_v50  ;;  %v1440_v50 = vld [vmem:[%s2902_s8 + $0x1e0] sm:$0xff]  ;;  %972 = vmatpush.msrb.mxu0 %v1406_v53  ;;  %v1451_v53 = vld [vmem:[%s2904_s10 + $0x1b0] sm:$0xff] }
 0x3f9   :  { %1055 = vmatpush.msrb.mxu2 %v1443_v43  ;;  %v1455_v43 = vld [vmem:[%s2904_s10 + $0x1d0] sm:$0xff] }
 0x3fa   :  { %973 = vmatpush.msrb.mxu0 %v1405_v56  ;;  %v1416_v56 = vld [vmem:[%s2900_s6 + $0x1a8] sm:$0xff] }
 0x3fb   :  { %1056 = vmatpush.msrb.mxu2 %v1442_v44  ;;  %v1421_v44 = vld [vmem:[%s2900_s6 + $0x1d0] sm:$0xff] }
 0x3fc   :  { %974 = vmatpush.msrb.mxu0 %v1404_v59  ;;  %1017 = vmatpush.msrb.mxu1 %v1421_v44  ;;  %v1449_v59 = vld [vmem:[%s2904_s10 + $0x1a0] sm:$0xff] }
 0x3fd   :  { %1057 = vmatpush.msrb.mxu2 %v1441_v48  ;;  %v1419_v48 = vld [vmem:[%s2900_s6 + $0x1c0] sm:$0xff] }
 0x3fe   :  { %975 = vmatpush.msrb.mxu0 %v1403_v62  ;;  %1018 = vmatpush.msrb.mxu1 %v1420_v46  ;;  %v1448_v62 = vld [vmem:[%s2904_s10 + $0x198] sm:$0xff] }
 0x3ff   :  { %1058 = vmatpush.msrb.mxu2 %v1440_v50  ;;  %v1418_v50 = vld [vmem:[%s2900_s6 + $0x1b8] sm:$0xff] }
 0x400   :  { %1019 = vmatpush.msrb.mxu1 %v1419_v48 }
 0x401   :  { %1059 = vmatpush.msrb.mxu2 %v1439_v54  ;;  %v1417_v54 = vld [vmem:[%s2900_s6 + $0x1b0] sm:$0xff] }
 0x402   :  { %1020 = vmatpush.msrb.mxu1 %v1418_v50 }
 0x403   :  { %1060 = vmatpush.msrb.mxu2 %v1438_v57 }
 0x404   :  { %1021 = vmatpush.msrb.mxu1 %v1417_v54 }
 0x405   :  { %1061 = vmatpush.msrb.mxu2 %v1437_v60 }
 0x406   :  { %1022 = vmatpush.msrb.mxu1 %v1416_v56 }
 0x470   :  { %v797_v4 = vpop.f32.mrf.mxu0 }
 0x471   :  { %v798_v5 = vadd.f32 %v1474_v0, %v797_v4  ;;  %v1436_v0 = vld [vmem:[%s2902_s8 + $0x1c0] sm:$0xff] }
 0x472   :  { %1062 = vmatpush.msrb.mxu2 %v1436_v0 }
 0x473   :  { %v800_v41 = vmax.f32 %v798_v5, 0.0 }
 0x475   :  { %839 = vmatmul.f32.vlgmr.msra.gmra.mxu1 %v800_v41  ;;  %v1402_v41 = vld [vmem:[%s2898_s4 + $0x1c0] sm:$0xff] }
 0x476   :  { %976 = vmatpush.msrb.mxu0 %v1402_v41  ;;  %v1447_v41 = vld [vmem:[%s2904_s10 + $0x190] sm:$0xff] }
 0x47b   :  { %v711_v52 = vpop.f32.mrf.mxu2 }
 0x47c   :  { %v712_v7 = vadd.f32 %v1475_v6, %v711_v52  ;;  %v1435_v6 = vld [vmem:[%s2902_s8 + $0x1b8] sm:$0xff] }
 0x47d   :  { %1063 = vmatpush.msrb.mxu2 %v1435_v6  ;;  %v1414_v6 = vld [vmem:[%s2900_s6 + $0x198] sm:$0xff] }
 0x47e   :  { %1497 = vtanh.f32 %v712_v7 }
 0x47f   :  { %1064 = vmatpush.msrb.mxu2 %v1434_v10  ;;  %v1411_v10 = vld [vmem:[%s2900_s6 + $0x180] sm:$0xff] }
 0x481   :  { %1065 = vmatpush.msrb.mxu2 %v1433_v15 }
 0x483   :  { %1066 = vmatpush.msrb.mxu2 %v1432_v17 }
 0x484   :  { %v1498_v8 = vpop.eup %1497 }
 0x485   :  { %753 = vmatmul.f32.vlgmr.msrb.gmra.mxu3 %v1498_v8  ;;  %v1401_v8 = vld [vmem:[%s2898_s4 + $0x1b8] sm:$0xff]  ;;  %1067 = vmatpush.msrb.mxu2 %v1431_v18  ;;  %s1143_s4 = sshll.u32 %s1533_s25, 4  ;;  %s1144_s4 = int_to_ptr.vmem [resolvable:$true] %s1143_s4 }
 0x486   :  { %977 = vmatpush.msrb.mxu0 %v1401_v8  ;;  %1098 = vmatpush.msrb.mxu3 %v1460_v31  ;;  %v1445_v8 = vld [vmem:[%s2904_s10 + $0x180] sm:$0xff] }
 0x487   :  { %1068 = vmatpush.msrb.mxu2 %v1430_v24 }
 0x488   :  { %978 = vmatpush.msrb.mxu0 %v1400_v14  ;;  %1099 = vmatpush.msrb.mxu3 %v1459_v32  ;;  %v1480_v14 = vld [vmem:[%s2903_s9 + $0x3] ss:$0 sm:$0xff] }
 0x48a   :  { %979 = vmatpush.msrb.mxu0 %v1399_v3  ;;  %1100 = vmatpush.msrb.mxu3 %v1458_v36 }
 0x48c   :  { %980 = vmatpush.msrb.mxu0 %v1398_v25  ;;  %1101 = vmatpush.msrb.mxu3 %v1457_v38 }
 0x48e   :  { %981 = vmatpush.msrb.mxu0 %v1397_v26  ;;  %1102 = vmatpush.msrb.mxu3 %v1456_v40 }
 0x490   :  { %982 = vmatpush.msrb.mxu0 %v1396_v28  ;;  %1103 = vmatpush.msrb.mxu3 %v1455_v43 }
 0x492   :  { %983 = vmatpush.msrb.mxu0 %v1395_v29  ;;  %1104 = vmatpush.msrb.mxu3 %v1454_v45 }
 0x494   :  { %984 = vmatpush.msrb.mxu0 %v1394_v30  ;;  %1105 = vmatpush.msrb.mxu3 %v1453_v47 }
 0x496   :  { %1106 = vmatpush.msrb.mxu3 %v1452_v49 }
 0x498   :  { %1107 = vmatpush.msrb.mxu3 %v1451_v53 }
 0x49a   :  { %1108 = vmatpush.msrb.mxu3 %v1450_v55 }
 0x49c   :  { %1109 = vmatpush.msrb.mxu3 %v1449_v59 }
 0x49e   :  { %1110 = vmatpush.msrb.mxu3 %v1448_v62 }
 0x4a0   :  { %1111 = vmatpush.msrb.mxu3 %v1447_v41 }
 0x4f2   :  { %v840_v4 = vpop.f32.mrf.mxu1 }
 0x4f3   :  { %v841_v9 = vadd.f32 %v1476_v34, %v840_v4 }
 0x4f5   :  { %v843_v16 = vsub.f32 %v2419_v12, %v841_v9  ;;  %v1478_v12 = vld [vmem:[%s2895_s1 + $0x3] ss:$0 sm:$0xff]  ;;  %v1412_v9 = vld [vmem:[%s2900_s6 + $0x188] sm:$0xff] }
 0x508   :  { %v754_v63 = vpop.f32.mrf.mxu3 }
 0x509   :  { %v755_v5 = vadd.f32 %v1477_v58, %v754_v63 }
 0x50b   :  { %v848_v52 = vsub.f32 0.0, %v755_v5  ;;  %v857_v7 = vmul.f32 %v855_v61, %v755_v5  ;;  %v1415_v5 = vld [vmem:[%s2900_s6 + $0x1a0] sm:$0xff] }
 0x50c   :  { %1023 = vmatpush.msrb.mxu1 %v1415_v5 }
 0x50d   :  { %v849_v11 = vmul.f32 1.442695, %v848_v52  ;;  %v2718_v2 = vadd.f32 %v857_v7, %v2397_v1  ;;  %v845_v1 = vperm.slane %v586_v51, 0  ;;  %v1393_v51 = vld [vmem:[%s2897_s3 + $0x6] sm:$0x3]  ;;  %v1446_v52 = vld [vmem:[%s2904_s10 + $0x188] sm:$0xff] }
 0x50e   :  { %v902_v57 = vperm.slane %v1393_v51, 0  ;;  %v903_v58 = vperm.slane %v1393_v51, 1  ;;  %1024 = vmatpush.msrb.mxu1 %v1414_v6  ;;  %1112 = vmatpush.msrb.mxu3 %v1446_v52  ;;  %v1413_v7 = vld [vmem:[%s2900_s6 + $0x190] sm:$0xff] }
 0x50f   :  { %1499 = vpow2.f32 %v849_v11  ;;  %v847_v19 = vmul.f32 %v845_v1, %v843_v16  ;;  %v1479_v11 = vld [vmem:[%s2899_s5 + $0x3] ss:$0 sm:$0xff] }
 0x510   :  { %1025 = vmatpush.msrb.mxu1 %v1413_v7  ;;  %1113 = vmatpush.msrb.mxu3 %v1445_v8 }
 0x512   :  { %1026 = vmatpush.msrb.mxu1 %v1412_v9 }
 0x514   :  { %1027 = vmatpush.msrb.mxu1 %v1411_v10 }
 0x515   :  { %v1500_v20 = vpop.eup %1499 }
 0x516   :  { %v851_v21 = vmul.f32 %v1500_v20, %v847_v19  ;;  %v1360_v19 = vld [vmem:[%s2895_s1 + $0x3] sm:$0x1]  ;;  %s1145_s1 = sshll.u32 %s2907_s13, 4  ;;  %s1146_s1 = int_to_ptr.hbm [resolvable:$true] %s1145_s1 }
 0x517   :  { %v861_v20 = vsub.f32 1.0, %v1360_v19 }
 0x518   :  { %v2740_v22 = vadd.f32 %v851_v21, %v2422_v13  ;;  %v1429_v13 = vld [vmem:[%s2902_s8 + $0x188] sm:$0xff] }
 0x519   :  { %1069 = vmatpush.msrb.mxu2 %v1429_v13  ;;  %v1128_v21 = vsub.f32 0.0, %v861_v20  ;;  %v1482_v13 = vld [vmem:[%s2905_s11 + $0x3] ss:$0 sm:$0xff]  ;;  %v1120_v35 = vperm.slane %v861_v20, 0 }
 0x51a   :  { %v2743_v23 = vmul.f32 %v1478_v12, %v2740_v22  ;;  %v1481_v12 = vld [vmem:[%s2901_s7 + $0x3] ss:$0 sm:$0xff] }
 0x51b   :  { %1070 = vmatpush.msrb.mxu2 %v1428_v27  ;;  %v1130_v24 = vperm.slane %v1128_v21, 0 }
 0x51c   :  { %922 = vmatmul.f32.vlgmr.msra.gmra.mxu2 %v2743_v23  ;;  %942 = vmatmul.f32.vlgmr.msra.gmra.mxu3 %v2743_v23 }
 0x59f   :  { %v923_v60 = vpop.f32.mrf.mxu2  ;;  %v943_v61 = vpop.f32.mrf.mxu3 }
 0x5a0   :  { %v924_v34 = vadd.f32 %v923_v60, %v902_v57  ;;  %v944_v63 = vadd.f32 %v943_v61, %v903_v58 }
 0x5a2   :  { %1501 = vtanh.f32 %v924_v34  ;;  %v1032_v0 = vmax.f32 %v944_v63, 0.0 }
 0x5a4   :  { %1071 = vmatmul.f32.vlgmr.msrb.gmra.mxu2 %v1032_v0 }
 0x5a8   :  { %v1502_v4 = vpop.eup %1501 }
 0x5a9   :  { %985 = vmatmul.f32.vlgmr.msrb.gmra.mxu0 %v1502_v4 }
 0x626   :  { %v986_v15 = vpop.f32.mrf.mxu0 }
 0x627   :  { %v987_v3 = vadd.f32 %v1479_v11, %v986_v15  ;;  %v1072_v16 = vpop.f32.mrf.mxu2 }
 0x628   :  { %v1073_v1 = vadd.f32 %v1480_v14, %v1072_v16 }
 0x629   :  { %1503 = vtanh.f32 %v987_v3 }
 0x62a   :  { %v1075_v17 = vmax.f32 %v1073_v1, 0.0 }
 0x62c   :  { %1114 = vmatmul.f32.vlgmr.msrb.gmra.mxu3 %v1075_v17 }
 0x62f   :  { %v1504_v18 = vpop.eup %1503 }
 0x630   :  { %1028 = vmatmul.f32.vlgmr.msrb.gmra.mxu1 %v1504_v18 }
 0x6ad   :  { %v1029_v25 = vpop.f32.mrf.mxu1 }
 0x6ae   :  { %v1030_v26 = vadd.f32 %v1481_v12, %v1029_v25 }
 0x6af   :  { %v1115_v27 = vpop.f32.mrf.mxu3 }
 0x6b0   :  { %v1123_v28 = vsub.f32 0.0, %v1030_v26  ;;  %v1132_v29 = vmul.f32 %v1130_v24, %v1030_v26  ;;  %v1116_v30 = vadd.f32 %v1482_v13, %v1115_v27 }
 0x6b2   :  { %v1124_v31 = vmul.f32 1.442695, %v1123_v28  ;;  %v1133_v32 = vadd.f32 %v1132_v29, %v2718_v2  ;;  %v1118_v33 = vsub.f32 %v2740_v22, %v1116_v30 }
 0x6b4   :  { %1505 = vpow2.f32 %v1124_v31  ;;  %1135 = vst [vmem:[#allocation2] sm:$0xff] %v1133_v32  ;;  %v1122_v36 = vmul.f32 %v1120_v35, %v1118_v33 }
 0x6b5   :  { %1148 = dma.vmem_to_hbm [thread:$0]  %s1144_s4, 128, %s1146_s1, [#allocation3]  }
 0x6ba   :  { %v1506_v37 = vpop.eup %1505 }
 0x6bb   :  { %v1126_v38 = vmul.f32 %v1506_v37, %v1122_v36 }
 0x6bd   :  { %v1127_v39 = vadd.f32 %v1126_v38, %v2743_v23 }
 0x6bf   :  { %1134 = vst [vmem:[%s2906_s12] sm:$0xff] %v1127_v39 }
 0x6c0   :  { %1531 = dma.done.wait [#allocation3], 128  }
 0x6c1   :  { %1532 = vsyncadd [#allocation3], 4294967168 }
 0x6c2   :  { %1155 = vsyncpa [#allocation3], 1 }

</bundles_post_ra>
